<compile_context>
chip_gen: v5e
topology: v5e:2x2
jax: 0.10.0
libtpu: 0.0.40
codegen_flags: <defaults>
</compile_context>

<pallas_src>
import functools

import jax
import jax.numpy as jnp
from jax.experimental import pallas as pl
from jax.experimental.pallas import tpu as pltpu


def rrcnn_kernel(x_ref, mask_ref, w1_ref, b1_ref, wa_ref, ba_ref, wb_ref, bb_ref,
                 o_ref, stk_ref, *, W, Co, T, compute_dtype):
    """One grid step: all channels x (images_per_group * H * W) lanes."""
    L = x_ref.shape[-1]
    cdt = compute_dtype

    # ---- 1x1 conv: single channel-mix matmul (cdt operands, f32 accumulate) ---
    x0 = jnp.dot(w1_ref[...], x_ref[...].astype(cdt),
                 preferred_element_type=jnp.float32) + b1_ref[...]      # (Co, L) f32

    # Host-precomputed f32 0/1 border masks, one row per 3x3 tap (loaded once).
    masks = mask_ref[...]                                               # (9, L) f32

    # tap k = 3*(dh+1) + (dw+1); shifted[p] = cur[p + dh*W + dw] via lane roll.
    taps = [(dh, dw) for dh in (-1, 0, 1) for dw in (-1, 0, 1)]
    shifts = [(-(dh * W + dw)) % L for dh, dw in taps]

    def conv3x3_bn_relu(cur, w_ref, b_ref):
        # Build the (9*Co, L) stacked tap input in VMEM, then ONE deep-K matmul:
        # (Co, 9*Co) @ (9*Co, L).  Rolls are XLU work, mask-multiplies are f32
        # VPU work, the MXU does all accumulation (no per-tap VALU adds).
        for k in range(9):
            s = shifts[k]
            sh = cur if s == 0 else pltpu.roll(cur, s, axis=1)
            if s != 0:                                   # center tap needs no mask
                sh = sh * masks[k:k + 1, :]
            stk_ref[pl.ds(k * Co, Co), :] = sh.astype(cdt)
        acc = jnp.dot(w_ref[...], stk_ref[...], preferred_element_type=jnp.float32)
        return jnp.maximum(acc + b_ref[...], 0.0)        # BN folded into w/b

    def recurrent_block(z, w_ref, b_ref):
        # Mirrors Recurrent_block.forward exactly (same weights every step).
        x1 = None
        for i in range(T):
            if i == 0:
                x1 = conv3x3_bn_relu(z, w_ref, b_ref)
            x1 = conv3x3_bn_relu(z + x1, w_ref, b_ref)
        return x1

    x1 = recurrent_block(x0, wa_ref, ba_ref)
    x2 = recurrent_block(x1, wb_ref, bb_ref)
    o_ref[...] = (x0 + x2).astype(o_ref.dtype)           # residual


def _fold_bn(w, b, gamma, beta, mean, var, eps=1e-5):
    """Fold eval-mode BatchNorm into the preceding conv's weight/bias (f32)."""
    scale = gamma / jnp.sqrt(var + eps)
    return w * scale[:, None, None, None], (b - mean) * scale + beta


def _border_masks(H, W):
    """f32 0/1 validity mask per 3x3 tap over the flattened (H*W) spatial axis."""
    q = jnp.arange(H * W, dtype=jnp.int32)
    h_idx = q // W
    w_idx = q % W
    rows = []
    for dh in (-1, 0, 1):
        for dw in (-1, 0, 1):
            m = jnp.ones((H * W,), jnp.float32)
            if dh < 0:
                m = m * (h_idx >= -dh).astype(jnp.float32)
            if dh > 0:
                m = m * (h_idx < H - dh).astype(jnp.float32)
            if dw < 0:
                m = m * (w_idx >= -dw).astype(jnp.float32)
            if dw > 0:
                m = m * (w_idx < W - dw).astype(jnp.float32)
            rows.append(m)
    return jnp.stack(rows, axis=0)                                      # (9, H*W)


def rrcnn_block(x, params, t=2, compute_dtype=jnp.bfloat16):
    """x: (B, ch_in, H, W) float32 -> (B, ch_out, H, W)."""
    B, Ci, H, W = x.shape
    HW = H * W
    w1 = params["conv1x1_w"]                                  # (Co, Ci, 1, 1)
    b1 = params["conv1x1_b"]                                  # (Co,)
    Co = w1.shape[0]

    wa, ba = _fold_bn(params["convA_w"], params["convA_b"], params["bnA_g"],
                      params["bnA_b"], params["bnA_m"], params["bnA_v"])
    wb, bb = _fold_bn(params["convB_w"], params["convB_b"], params["bnB_g"],
                      params["bnB_b"], params["bnB_m"], params["bnB_v"])

    # Deep-K fused tap weights: (Co, Ci, 3, 3) -> (Co, kh, kw, Ci) -> (Co, 9*Ci),
    # row order k*Ci + i (k = 3*kh + kw), matching the stacked input layout.
    wa_f = jnp.transpose(wa, (0, 2, 3, 1)).reshape(Co, 9 * Co).astype(compute_dtype)
    wb_f = jnp.transpose(wb, (0, 2, 3, 1)).reshape(Co, 9 * Co).astype(compute_dtype)
    w1_f = w1.reshape(Co, Ci).astype(compute_dtype)

    # Fold the whole batch into the lane axis for small feature maps (longer,
    # lane-dense matmul N; weights/masks fetched once; one grid step).  For
    # large maps ipg=1, so the reshapes below are free (no HBM transpose) and
    # the grid runs one image per step.
    ipg = B if B * HW <= 32768 else 1
    G = B // ipg
    L = ipg * HW

    x_cb = x.reshape(G, ipg, Ci, HW).transpose(0, 2, 1, 3).reshape(G, Ci, L)
    mask = jnp.tile(_border_masks(H, W), (1, ipg))            # (9, L)

    kernel = functools.partial(rrcnn_kernel, W=W, Co=Co, T=t,
                               compute_dtype=compute_dtype)
    out = pl.pallas_call(
        kernel,
        out_shape=jax.ShapeDtypeStruct((G, Co, L), x.dtype),
        grid_spec=pltpu.PrefetchScalarGridSpec(
            num_scalar_prefetch=0,
            grid=(G,),
            # TODO(synk): at realistic R2U-Net sizes (Co>=128, 128x128 maps) add a
            # second grid axis over H tiles with a 1-row halo so x0/x1/stack stay
            # bounded under v7x's 64 MiB VMEM; this whole-map-per-step scheme
            # targets small maps.
            # TODO(synk): pipeline_mode=pl.Buffered(1) on the constant-index
            # weight/bias/mask specs would drop their double buffers (only matters
            # at Co>=128 on v7x; they are tiny at these shapes).
            in_specs=[
                pl.BlockSpec((None, Ci, L), lambda g: (g, 0, 0)),     # x
                pl.BlockSpec((9, L), lambda g: (0, 0)),               # border masks
                pl.BlockSpec((Co, Ci), lambda g: (0, 0)),             # 1x1 weight
                pl.BlockSpec((Co, 1), lambda g: (0, 0)),              # 1x1 bias
                pl.BlockSpec((Co, 9 * Co), lambda g: (0, 0)),         # block A fused taps
                pl.BlockSpec((Co, 1), lambda g: (0, 0)),              # block A bias
                pl.BlockSpec((Co, 9 * Co), lambda g: (0, 0)),         # block B fused taps
                pl.BlockSpec((Co, 1), lambda g: (0, 0)),              # block B bias
            ],
            out_specs=pl.BlockSpec((None, Co, L), lambda g: (g, 0, 0)),
            scratch_shapes=[pltpu.VMEM((9 * Co, L), compute_dtype)],  # stacked taps
        ),
        compiler_params=pltpu.CompilerParams(
            dimension_semantics=("parallel",),
            # Raised above v5e's ~16 MiB scoped default; raise further (toward the
            # chip's physical VMEM) for realistic channel/spatial sizes.
            vmem_limit_bytes=32 * 1024 * 1024),
    )(x_cb, mask, w1_f, b1.reshape(Co, 1), wa_f, ba.reshape(Co, 1),
      wb_f, bb.reshape(Co, 1))

    return out.reshape(G, Co, ipg, HW).transpose(0, 2, 1, 3).reshape(B, Co, H, W)


def rrcnn_reference(x, params, t=2, eps=1e-5):
    """Pure-JAX mirror of the PyTorch module (eval-mode BatchNorm), f32."""
    dn = ("NCHW", "OIHW", "NCHW")
    hi = jax.lax.Precision.HIGHEST

    def cbr(z, w, b, g, beta, m, v):
        y = jax.lax.conv_general_dilated(z, w, (1, 1), ((1, 1), (1, 1)),
                                         dimension_numbers=dn, precision=hi)
        y = y + b[None, :, None, None]
        y = (g[None, :, None, None] * (y - m[None, :, None, None])
             / jnp.sqrt(v[None, :, None, None] + eps)
             + beta[None, :, None, None])
        return jnp.maximum(y, 0.0)

    def recurrent(z, w, b, g, beta, m, v):
        x1 = None
        for i in range(t):
            if i == 0:
                x1 = cbr(z, w, b, g, beta, m, v)
            x1 = cbr(z + x1, w, b, g, beta, m, v)
        return x1

    x0 = jax.lax.conv_general_dilated(x, params["conv1x1_w"], (1, 1), "VALID",
                                      dimension_numbers=dn, precision=hi)
    x0 = x0 + params["conv1x1_b"][None, :, None, None]
    x1 = recurrent(x0, params["convA_w"], params["convA_b"], params["bnA_g"],
                   params["bnA_b"], params["bnA_m"], params["bnA_v"])
    x2 = recurrent(x1, params["convB_w"], params["convB_b"], params["bnB_g"],
                   params["bnB_b"], params["bnB_m"], params["bnB_v"])
    return x0 + x2


if __name__ == "__main__":
    key = jax.random.PRNGKey(0)
    ks = jax.random.split(key, 15)

    B, Ci, Co, H, W = 2, 4, 8, 16, 16
    t = 2

    x = jax.random.normal(ks[0], (B, Ci, H, W), dtype=jnp.float32)
    params = {
        "conv1x1_w": 0.3 * jax.random.normal(ks[1], (Co, Ci, 1, 1), jnp.float32),
        "conv1x1_b": 0.1 * jax.random.normal(ks[2], (Co,), jnp.float32),
        "convA_w": 0.1 * jax.random.normal(ks[3], (Co, Co, 3, 3), jnp.float32),
        "convA_b": 0.1 * jax.random.normal(ks[4], (Co,), jnp.float32),
        "bnA_g": 1.0 + 0.1 * jax.random.normal(ks[5], (Co,), jnp.float32),
        "bnA_b": 0.1 * jax.random.normal(ks[6], (Co,), jnp.float32),
        "bnA_m": 0.1 * jax.random.normal(ks[7], (Co,), jnp.float32),
        "bnA_v": 1.0 + 0.1 * jnp.abs(jax.random.normal(ks[8], (Co,), jnp.float32)),
        "convB_w": 0.1 * jax.random.normal(ks[9], (Co, Co, 3, 3), jnp.float32),
        "convB_b": 0.1 * jax.random.normal(ks[10], (Co,), jnp.float32),
        "bnB_g": 1.0 + 0.1 * jax.random.normal(ks[11], (Co,), jnp.float32),
        "bnB_b": 0.1 * jax.random.normal(ks[12], (Co,), jnp.float32),
        "bnB_m": 0.1 * jax.random.normal(ks[13], (Co,), jnp.float32),
        "bnB_v": 1.0 + 0.1 * jnp.abs(jax.random.normal(ks[14], (Co,), jnp.float32)),
    }

    ref = rrcnn_reference(x, params, t=t)

    # Structural correctness check in f32 compute mode (tight tolerance).
    out_f32 = jax.block_until_ready(
        rrcnn_block(x, params, t=t, compute_dtype=jnp.float32))
    assert out_f32.shape == (B, Co, H, W) and out_f32.dtype == x.dtype
    assert jnp.allclose(out_f32, ref, atol=2e-3, rtol=2e-3), \
        f"f32 max abs err {float(jnp.max(jnp.abs(out_f32 - ref)))}"

    # Default fast path: bf16 MXU operands, f32 accumulate/elementwise
    # (looser tolerance: rounding compounds across the 7 chained matmuls).
    out_bf = jax.block_until_ready(rrcnn_block(x, params, t=t))
    assert out_bf.shape == (B, Co, H, W) and out_bf.dtype == x.dtype
    assert jnp.allclose(out_bf, ref, atol=5e-2, rtol=5e-2), \
        f"bf16 max abs err {float(jnp.max(jnp.abs(out_bf - ref)))}"

    print("KERNEL_OK")
</pallas_src>

<mosaic_0001>
module attributes {stable_mosaic.version = 11 : i64} {
  func.func @rrcnn_kernel(%arg0: i32, %arg1: memref<1x4x512xf32, #tpu.memory_space<vmem>>, %arg2: memref<9x512xf32, #tpu.memory_space<vmem>>, %arg3: memref<8x4xf32, #tpu.memory_space<vmem>>, %arg4: memref<8x1xf32, #tpu.memory_space<vmem>>, %arg5: memref<8x72xf32, #tpu.memory_space<vmem>>, %arg6: memref<8x1xf32, #tpu.memory_space<vmem>>, %arg7: memref<8x72xf32, #tpu.memory_space<vmem>>, %arg8: memref<8x1xf32, #tpu.memory_space<vmem>>, %arg9: memref<1x8x512xf32, #tpu.memory_space<vmem>>, %arg10: memref<72x512xf32, #tpu.memory_space<vmem>>) attributes {dimension_semantics = [#tpu.dimension_semantics<parallel>], iteration_bounds = array<i64: 1>, scalar_prefetch = 0 : i64, scratch_operands = 1 : i64, tpu.core_type = #tpu.core_type<tc>, window_params = [{transform_indices = @transform_0, window_bounds = array<i64: 1, 4, 512>}, {pipeline_mode = #tpu.pipeline_mode<synchronous>, transform_indices = @transform_1, window_bounds = array<i64: 9, 512>}, {pipeline_mode = #tpu.pipeline_mode<synchronous>, transform_indices = @transform_2, window_bounds = array<i64: 8, 4>}, {pipeline_mode = #tpu.pipeline_mode<synchronous>, transform_indices = @transform_3, window_bounds = array<i64: 8, 1>}, {pipeline_mode = #tpu.pipeline_mode<synchronous>, transform_indices = @transform_4, window_bounds = array<i64: 8, 72>}, {pipeline_mode = #tpu.pipeline_mode<synchronous>, transform_indices = @transform_5, window_bounds = array<i64: 8, 1>}, {pipeline_mode = #tpu.pipeline_mode<synchronous>, transform_indices = @transform_6, window_bounds = array<i64: 8, 72>}, {pipeline_mode = #tpu.pipeline_mode<synchronous>, transform_indices = @transform_7, window_bounds = array<i64: 8, 1>}, {transform_indices = @transform_8, window_bounds = array<i64: 1, 8, 512>}]} {
    %c0 = arith.constant 0 : index
    %c0_0 = arith.constant 0 : index
    %0 = vector.load %arg3[%c0, %c0_0] : memref<8x4xf32, #tpu.memory_space<vmem>>, vector<8x4xf32>
    %c0_1 = arith.constant 0 : index
    %c0_2 = arith.constant 0 : index
    %c0_3 = arith.constant 0 : index
    %1 = vector.load %arg1[%c0_1, %c0_2, %c0_3] : memref<1x4x512xf32, #tpu.memory_space<vmem>>, vector<1x4x512xf32>
    %2 = vector.shape_cast %1 : vector<1x4x512xf32> to vector<4x512xf32>
    %cst = arith.constant dense<0.000000e+00> : vector<8x512xf32>
    %3 = tpu.matmul %0, %2, %cst {dimension_numbers = #tpu.dot_dimension_numbers<[1], [0], [0], [1], [0, 0, 1, 1], [], []>} : vector<8x4xf32>, vector<4x512xf32>, vector<8x512xf32> -> vector<8x512xf32>
    %c0_4 = arith.constant 0 : index
    %c0_5 = arith.constant 0 : index
    %4 = vector.load %arg4[%c0_4, %c0_5] : memref<8x1xf32, #tpu.memory_space<vmem>>, vector<8x1xf32>
    %5 = vector.broadcast %4 : vector<8x1xf32> to vector<8x512xf32>
    %6 = arith.addf %3, %5 : vector<8x512xf32>
    %c0_6 = arith.constant 0 : index
    %c0_7 = arith.constant 0 : index
    %7 = vector.load %arg2[%c0_6, %c0_7] : memref<9x512xf32, #tpu.memory_space<vmem>>, vector<9x512xf32>
    %c17_i32 = arith.constant 17 : i32
    %8 = tpu.dynamic_rotate %6 by %c17_i32 dim 1 : vector<8x512xf32>, i32 -> vector<8x512xf32>
    %9 = vector.extract_strided_slice %7 {offsets = [0, 0], sizes = [1, 512], strides = [1, 1]} : vector<9x512xf32> to vector<1x512xf32>
    %10 = vector.broadcast %9 : vector<1x512xf32> to vector<8x512xf32>
    %11 = arith.mulf %8, %10 : vector<8x512xf32>
    %c0_8 = arith.constant 0 : index
    %c0_9 = arith.constant 0 : index
    %12 = vector.load %arg10[%c0_8, %c0_9] : memref<72x512xf32, #tpu.memory_space<vmem>>, vector<8x512xf32>
    tpu.vector_store %arg10[%c0_8, %c0_9], %11 {strides = array<i32>} : memref<72x512xf32, #tpu.memory_space<vmem>>, vector<8x512xf32>,
    %c16_i32 = arith.constant 16 : i32
    %13 = tpu.dynamic_rotate %6 by %c16_i32 dim 1 : vector<8x512xf32>, i32 -> vector<8x512xf32>
    %14 = vector.extract_strided_slice %7 {offsets = [1, 0], sizes = [1, 512], strides = [1, 1]} : vector<9x512xf32> to vector<1x512xf32>
    %15 = vector.broadcast %14 : vector<1x512xf32> to vector<8x512xf32>
    %16 = arith.mulf %13, %15 : vector<8x512xf32>
    %c8 = arith.constant 8 : index
    %c0_10 = arith.constant 0 : index
    %17 = vector.load %arg10[%c8, %c0_10] : memref<72x512xf32, #tpu.memory_space<vmem>>, vector<8x512xf32>
    tpu.vector_store %arg10[%c8, %c0_10], %16 {strides = array<i32>} : memref<72x512xf32, #tpu.memory_space<vmem>>, vector<8x512xf32>,
    %c15_i32 = arith.constant 15 : i32
    %18 = tpu.dynamic_rotate %6 by %c15_i32 dim 1 : vector<8x512xf32>, i32 -> vector<8x512xf32>
    %19 = vector.extract_strided_slice %7 {offsets = [2, 0], sizes = [1, 512], strides = [1, 1]} : vector<9x512xf32> to vector<1x512xf32>
    %20 = vector.broadcast %19 : vector<1x512xf32> to vector<8x512xf32>
    %21 = arith.mulf %18, %20 : vector<8x512xf32>
    %c16 = arith.constant 16 : index
    %c0_11 = arith.constant 0 : index
    %22 = vector.load %arg10[%c16, %c0_11] : memref<72x512xf32, #tpu.memory_space<vmem>>, vector<8x512xf32>
    tpu.vector_store %arg10[%c16, %c0_11], %21 {strides = array<i32>} : memref<72x512xf32, #tpu.memory_space<vmem>>, vector<8x512xf32>,
    %c1_i32 = arith.constant 1 : i32
    %23 = tpu.dynamic_rotate %6 by %c1_i32 dim 1 : vector<8x512xf32>, i32 -> vector<8x512xf32>
    %24 = vector.extract_strided_slice %7 {offsets = [3, 0], sizes = [1, 512], strides = [1, 1]} : vector<9x512xf32> to vector<1x512xf32>
    %25 = vector.broadcast %24 : vector<1x512xf32> to vector<8x512xf32>
    %26 = arith.mulf %23, %25 : vector<8x512xf32>
    %c24 = arith.constant 24 : index
    %c0_12 = arith.constant 0 : index
    %27 = vector.load %arg10[%c24, %c0_12] : memref<72x512xf32, #tpu.memory_space<vmem>>, vector<8x512xf32>
    tpu.vector_store %arg10[%c24, %c0_12], %26 {strides = array<i32>} : memref<72x512xf32, #tpu.memory_space<vmem>>, vector<8x512xf32>,
    %c32 = arith.constant 32 : index
    %c0_13 = arith.constant 0 : index
    %28 = vector.load %arg10[%c32, %c0_13] : memref<72x512xf32, #tpu.memory_space<vmem>>, vector<8x512xf32>
    tpu.vector_store %arg10[%c32, %c0_13], %6 {strides = array<i32>} : memref<72x512xf32, #tpu.memory_space<vmem>>, vector<8x512xf32>,
    %c511_i32 = arith.constant 511 : i32
    %29 = tpu.dynamic_rotate %6 by %c511_i32 dim 1 : vector<8x512xf32>, i32 -> vector<8x512xf32>
    %30 = vector.extract_strided_slice %7 {offsets = [5, 0], sizes = [1, 512], strides = [1, 1]} : vector<9x512xf32> to vector<1x512xf32>
    %31 = vector.broadcast %30 : vector<1x512xf32> to vector<8x512xf32>
    %32 = arith.mulf %29, %31 : vector<8x512xf32>
    %c40 = arith.constant 40 : index
    %c0_14 = arith.constant 0 : index
    %33 = vector.load %arg10[%c40, %c0_14] : memref<72x512xf32, #tpu.memory_space<vmem>>, vector<8x512xf32>
    tpu.vector_store %arg10[%c40, %c0_14], %32 {strides = array<i32>} : memref<72x512xf32, #tpu.memory_space<vmem>>, vector<8x512xf32>,
    %c497_i32 = arith.constant 497 : i32
    %34 = tpu.dynamic_rotate %6 by %c497_i32 dim 1 : vector<8x512xf32>, i32 -> vector<8x512xf32>
    %35 = vector.extract_strided_slice %7 {offsets = [6, 0], sizes = [1, 512], strides = [1, 1]} : vector<9x512xf32> to vector<1x512xf32>
    %36 = vector.broadcast %35 : vector<1x512xf32> to vector<8x512xf32>
    %37 = arith.mulf %34, %36 : vector<8x512xf32>
    %c48 = arith.constant 48 : index
    %c0_15 = arith.constant 0 : index
    %38 = vector.load %arg10[%c48, %c0_15] : memref<72x512xf32, #tpu.memory_space<vmem>>, vector<8x512xf32>
    tpu.vector_store %arg10[%c48, %c0_15], %37 {strides = array<i32>} : memref<72x512xf32, #tpu.memory_space<vmem>>, vector<8x512xf32>,
    %c496_i32 = arith.constant 496 : i32
    %39 = tpu.dynamic_rotate %6 by %c496_i32 dim 1 : vector<8x512xf32>, i32 -> vector<8x512xf32>
    %40 = vector.extract_strided_slice %7 {offsets = [7, 0], sizes = [1, 512], strides = [1, 1]} : vector<9x512xf32> to vector<1x512xf32>
    %41 = vector.broadcast %40 : vector<1x512xf32> to vector<8x512xf32>
    %42 = arith.mulf %39, %41 : vector<8x512xf32>
    %c56 = arith.constant 56 : index
    %c0_16 = arith.constant 0 : index
    %43 = vector.load %arg10[%c56, %c0_16] : memref<72x512xf32, #tpu.memory_space<vmem>>, vector<8x512xf32>
    tpu.vector_store %arg10[%c56, %c0_16], %42 {strides = array<i32>} : memref<72x512xf32, #tpu.memory_space<vmem>>, vector<8x512xf32>,
    %c495_i32 = arith.constant 495 : i32
    %44 = tpu.dynamic_rotate %6 by %c495_i32 dim 1 : vector<8x512xf32>, i32 -> vector<8x512xf32>
    %45 = vector.extract_strided_slice %7 {offsets = [8, 0], sizes = [1, 512], strides = [1, 1]} : vector<9x512xf32> to vector<1x512xf32>
    %46 = vector.broadcast %45 : vector<1x512xf32> to vector<8x512xf32>
    %47 = arith.mulf %44, %46 : vector<8x512xf32>
    %c64 = arith.constant 64 : index
    %c0_17 = arith.constant 0 : index
    %48 = vector.load %arg10[%c64, %c0_17] : memref<72x512xf32, #tpu.memory_space<vmem>>, vector<8x512xf32>
    tpu.vector_store %arg10[%c64, %c0_17], %47 {strides = array<i32>} : memref<72x512xf32, #tpu.memory_space<vmem>>, vector<8x512xf32>,
    %c0_18 = arith.constant 0 : index
    %c0_19 = arith.constant 0 : index
    %49 = vector.load %arg5[%c0_18, %c0_19] : memref<8x72xf32, #tpu.memory_space<vmem>>, vector<8x72xf32>
    %c0_20 = arith.constant 0 : index
    %c0_21 = arith.constant 0 : index
    %50 = vector.load %arg10[%c0_20, %c0_21] : memref<72x512xf32, #tpu.memory_space<vmem>>, vector<72x512xf32>
    %cst_22 = arith.constant dense<0.000000e+00> : vector<8x512xf32>
    %51 = tpu.matmul %49, %50, %cst_22 {dimension_numbers = #tpu.dot_dimension_numbers<[1], [0], [0], [1], [0, 0, 1, 1], [], []>} : vector<8x72xf32>, vector<72x512xf32>, vector<8x512xf32> -> vector<8x512xf32>
    %c0_23 = arith.constant 0 : index
    %c0_24 = arith.constant 0 : index
    %52 = vector.load %arg6[%c0_23, %c0_24] : memref<8x1xf32, #tpu.memory_space<vmem>>, vector<8x1xf32>
    %53 = vector.broadcast %52 : vector<8x1xf32> to vector<8x512xf32>
    %54 = arith.addf %51, %53 : vector<8x512xf32>
    %cst_25 = arith.constant 0.000000e+00 : f32
    %55 = vector.broadcast %cst_25 : f32 to vector<8x512xf32>
    %56 = arith.maximumf %54, %55 : vector<8x512xf32>
    %57 = arith.addf %6, %56 : vector<8x512xf32>
    %c17_i32_26 = arith.constant 17 : i32
    %58 = tpu.dynamic_rotate %57 by %c17_i32_26 dim 1 : vector<8x512xf32>, i32 -> vector<8x512xf32>
    %59 = vector.extract_strided_slice %7 {offsets = [0, 0], sizes = [1, 512], strides = [1, 1]} : vector<9x512xf32> to vector<1x512xf32>
    %60 = vector.broadcast %59 : vector<1x512xf32> to vector<8x512xf32>
    %61 = arith.mulf %58, %60 : vector<8x512xf32>
    %c0_27 = arith.constant 0 : index
    %c0_28 = arith.constant 0 : index
    %62 = vector.load %arg10[%c0_27, %c0_28] : memref<72x512xf32, #tpu.memory_space<vmem>>, vector<8x512xf32>
    tpu.vector_store %arg10[%c0_27, %c0_28], %61 {strides = array<i32>} : memref<72x512xf32, #tpu.memory_space<vmem>>, vector<8x512xf32>,
    %c16_i32_29 = arith.constant 16 : i32
    %63 = tpu.dynamic_rotate %57 by %c16_i32_29 dim 1 : vector<8x512xf32>, i32 -> vector<8x512xf32>
    %64 = vector.extract_strided_slice %7 {offsets = [1, 0], sizes = [1, 512], strides = [1, 1]} : vector<9x512xf32> to vector<1x512xf32>
    %65 = vector.broadcast %64 : vector<1x512xf32> to vector<8x512xf32>
    %66 = arith.mulf %63, %65 : vector<8x512xf32>
    %c8_30 = arith.constant 8 : index
    %c0_31 = arith.constant 0 : index
    %67 = vector.load %arg10[%c8_30, %c0_31] : memref<72x512xf32, #tpu.memory_space<vmem>>, vector<8x512xf32>
    tpu.vector_store %arg10[%c8_30, %c0_31], %66 {strides = array<i32>} : memref<72x512xf32, #tpu.memory_space<vmem>>, vector<8x512xf32>,
    %c15_i32_32 = arith.constant 15 : i32
    %68 = tpu.dynamic_rotate %57 by %c15_i32_32 dim 1 : vector<8x512xf32>, i32 -> vector<8x512xf32>
    %69 = vector.extract_strided_slice %7 {offsets = [2, 0], sizes = [1, 512], strides = [1, 1]} : vector<9x512xf32> to vector<1x512xf32>
    %70 = vector.broadcast %69 : vector<1x512xf32> to vector<8x512xf32>
    %71 = arith.mulf %68, %70 : vector<8x512xf32>
    %c16_33 = arith.constant 16 : index
    %c0_34 = arith.constant 0 : index
    %72 = vector.load %arg10[%c16_33, %c0_34] : memref<72x512xf32, #tpu.memory_space<vmem>>, vector<8x512xf32>
    tpu.vector_store %arg10[%c16_33, %c0_34], %71 {strides = array<i32>} : memref<72x512xf32, #tpu.memory_space<vmem>>, vector<8x512xf32>,
    %c1_i32_35 = arith.constant 1 : i32
    %73 = tpu.dynamic_rotate %57 by %c1_i32_35 dim 1 : vector<8x512xf32>, i32 -> vector<8x512xf32>
    %74 = vector.extract_strided_slice %7 {offsets = [3, 0], sizes = [1, 512], strides = [1, 1]} : vector<9x512xf32> to vector<1x512xf32>
    %75 = vector.broadcast %74 : vector<1x512xf32> to vector<8x512xf32>
    %76 = arith.mulf %73, %75 : vector<8x512xf32>
    %c24_36 = arith.constant 24 : index
    %c0_37 = arith.constant 0 : index
    %77 = vector.load %arg10[%c24_36, %c0_37] : memref<72x512xf32, #tpu.memory_space<vmem>>, vector<8x512xf32>
    tpu.vector_store %arg10[%c24_36, %c0_37], %76 {strides = array<i32>} : memref<72x512xf32, #tpu.memory_space<vmem>>, vector<8x512xf32>,
    %c32_38 = arith.constant 32 : index
    %c0_39 = arith.constant 0 : index
    %78 = vector.load %arg10[%c32_38, %c0_39] : memref<72x512xf32, #tpu.memory_space<vmem>>, vector<8x512xf32>
    tpu.vector_store %arg10[%c32_38, %c0_39], %57 {strides = array<i32>} : memref<72x512xf32, #tpu.memory_space<vmem>>, vector<8x512xf32>,
    %c511_i32_40 = arith.constant 511 : i32
    %79 = tpu.dynamic_rotate %57 by %c511_i32_40 dim 1 : vector<8x512xf32>, i32 -> vector<8x512xf32>
    %80 = vector.extract_strided_slice %7 {offsets = [5, 0], sizes = [1, 512], strides = [1, 1]} : vector<9x512xf32> to vector<1x512xf32>
    %81 = vector.broadcast %80 : vector<1x512xf32> to vector<8x512xf32>
    %82 = arith.mulf %79, %81 : vector<8x512xf32>
    %c40_41 = arith.constant 40 : index
    %c0_42 = arith.constant 0 : index
    %83 = vector.load %arg10[%c40_41, %c0_42] : memref<72x512xf32, #tpu.memory_space<vmem>>, vector<8x512xf32>
    tpu.vector_store %arg10[%c40_41, %c0_42], %82 {strides = array<i32>} : memref<72x512xf32, #tpu.memory_space<vmem>>, vector<8x512xf32>,
    %c497_i32_43 = arith.constant 497 : i32
    %84 = tpu.dynamic_rotate %57 by %c497_i32_43 dim 1 : vector<8x512xf32>, i32 -> vector<8x512xf32>
    %85 = vector.extract_strided_slice %7 {offsets = [6, 0], sizes = [1, 512], strides = [1, 1]} : vector<9x512xf32> to vector<1x512xf32>
    %86 = vector.broadcast %85 : vector<1x512xf32> to vector<8x512xf32>
    %87 = arith.mulf %84, %86 : vector<8x512xf32>
    %c48_44 = arith.constant 48 : index
    %c0_45 = arith.constant 0 : index
    %88 = vector.load %arg10[%c48_44, %c0_45] : memref<72x512xf32, #tpu.memory_space<vmem>>, vector<8x512xf32>
    tpu.vector_store %arg10[%c48_44, %c0_45], %87 {strides = array<i32>} : memref<72x512xf32, #tpu.memory_space<vmem>>, vector<8x512xf32>,
    %c496_i32_46 = arith.constant 496 : i32
    %89 = tpu.dynamic_rotate %57 by %c496_i32_46 dim 1 : vector<8x512xf32>, i32 -> vector<8x512xf32>
    %90 = vector.extract_strided_slice %7 {offsets = [7, 0], sizes = [1, 512], strides = [1, 1]} : vector<9x512xf32> to vector<1x512xf32>
    %91 = vector.broadcast %90 : vector<1x512xf32> to vector<8x512xf32>
    %92 = arith.mulf %89, %91 : vector<8x512xf32>
    %c56_47 = arith.constant 56 : index
    %c0_48 = arith.constant 0 : index
    %93 = vector.load %arg10[%c56_47, %c0_48] : memref<72x512xf32, #tpu.memory_space<vmem>>, vector<8x512xf32>
    tpu.vector_store %arg10[%c56_47, %c0_48], %92 {strides = array<i32>} : memref<72x512xf32, #tpu.memory_space<vmem>>, vector<8x512xf32>,
    %c495_i32_49 = arith.constant 495 : i32
    %94 = tpu.dynamic_rotate %57 by %c495_i32_49 dim 1 : vector<8x512xf32>, i32 -> vector<8x512xf32>
    %95 = vector.extract_strided_slice %7 {offsets = [8, 0], sizes = [1, 512], strides = [1, 1]} : vector<9x512xf32> to vector<1x512xf32>
    %96 = vector.broadcast %95 : vector<1x512xf32> to vector<8x512xf32>
    %97 = arith.mulf %94, %96 : vector<8x512xf32>
    %c64_50 = arith.constant 64 : index
    %c0_51 = arith.constant 0 : index
    %98 = vector.load %arg10[%c64_50, %c0_51] : memref<72x512xf32, #tpu.memory_space<vmem>>, vector<8x512xf32>
    tpu.vector_store %arg10[%c64_50, %c0_51], %97 {strides = array<i32>} : memref<72x512xf32, #tpu.memory_space<vmem>>, vector<8x512xf32>,
    %c0_52 = arith.constant 0 : index
    %c0_53 = arith.constant 0 : index
    %99 = vector.load %arg5[%c0_52, %c0_53] : memref<8x72xf32, #tpu.memory_space<vmem>>, vector<8x72xf32>
    %c0_54 = arith.constant 0 : index
    %c0_55 = arith.constant 0 : index
    %100 = vector.load %arg10[%c0_54, %c0_55] : memref<72x512xf32, #tpu.memory_space<vmem>>, vector<72x512xf32>
    %cst_56 = arith.constant dense<0.000000e+00> : vector<8x512xf32>
    %101 = tpu.matmul %99, %100, %cst_56 {dimension_numbers = #tpu.dot_dimension_numbers<[1], [0], [0], [1], [0, 0, 1, 1], [], []>} : vector<8x72xf32>, vector<72x512xf32>, vector<8x512xf32> -> vector<8x512xf32>
    %c0_57 = arith.constant 0 : index
    %c0_58 = arith.constant 0 : index
    %102 = vector.load %arg6[%c0_57, %c0_58] : memref<8x1xf32, #tpu.memory_space<vmem>>, vector<8x1xf32>
    %103 = vector.broadcast %102 : vector<8x1xf32> to vector<8x512xf32>
    %104 = arith.addf %101, %103 : vector<8x512xf32>
    %cst_59 = arith.constant 0.000000e+00 : f32
    %105 = vector.broadcast %cst_59 : f32 to vector<8x512xf32>
    %106 = arith.maximumf %104, %105 : vector<8x512xf32>
    %107 = arith.addf %6, %106 : vector<8x512xf32>
    %c17_i32_60 = arith.constant 17 : i32
    %108 = tpu.dynamic_rotate %107 by %c17_i32_60 dim 1 : vector<8x512xf32>, i32 -> vector<8x512xf32>
    %109 = vector.extract_strided_slice %7 {offsets = [0, 0], sizes = [1, 512], strides = [1, 1]} : vector<9x512xf32> to vector<1x512xf32>
    %110 = vector.broadcast %109 : vector<1x512xf32> to vector<8x512xf32>
    %111 = arith.mulf %108, %110 : vector<8x512xf32>
    %c0_61 = arith.constant 0 : index
    %c0_62 = arith.constant 0 : index
    %112 = vector.load %arg10[%c0_61, %c0_62] : memref<72x512xf32, #tpu.memory_space<vmem>>, vector<8x512xf32>
    tpu.vector_store %arg10[%c0_61, %c0_62], %111 {strides = array<i32>} : memref<72x512xf32, #tpu.memory_space<vmem>>, vector<8x512xf32>,
    %c16_i32_63 = arith.constant 16 : i32
    %113 = tpu.dynamic_rotate %107 by %c16_i32_63 dim 1 : vector<8x512xf32>, i32 -> vector<8x512xf32>
    %114 = vector.extract_strided_slice %7 {offsets = [1, 0], sizes = [1, 512], strides = [1, 1]} : vector<9x512xf32> to vector<1x512xf32>
    %115 = vector.broadcast %114 : vector<1x512xf32> to vector<8x512xf32>
    %116 = arith.mulf %113, %115 : vector<8x512xf32>
    %c8_64 = arith.constant 8 : index
    %c0_65 = arith.constant 0 : index
    %117 = vector.load %arg10[%c8_64, %c0_65] : memref<72x512xf32, #tpu.memory_space<vmem>>, vector<8x512xf32>
    tpu.vector_store %arg10[%c8_64, %c0_65], %116 {strides = array<i32>} : memref<72x512xf32, #tpu.memory_space<vmem>>, vector<8x512xf32>,
    %c15_i32_66 = arith.constant 15 : i32
    %118 = tpu.dynamic_rotate %107 by %c15_i32_66 dim 1 : vector<8x512xf32>, i32 -> vector<8x512xf32>
    %119 = vector.extract_strided_slice %7 {offsets = [2, 0], sizes = [1, 512], strides = [1, 1]} : vector<9x512xf32> to vector<1x512xf32>
    %120 = vector.broadcast %119 : vector<1x512xf32> to vector<8x512xf32>
    %121 = arith.mulf %118, %120 : vector<8x512xf32>
    %c16_67 = arith.constant 16 : index
    %c0_68 = arith.constant 0 : index
    %122 = vector.load %arg10[%c16_67, %c0_68] : memref<72x512xf32, #tpu.memory_space<vmem>>, vector<8x512xf32>
    tpu.vector_store %arg10[%c16_67, %c0_68], %121 {strides = array<i32>} : memref<72x512xf32, #tpu.memory_space<vmem>>, vector<8x512xf32>,
    %c1_i32_69 = arith.constant 1 : i32
    %123 = tpu.dynamic_rotate %107 by %c1_i32_69 dim 1 : vector<8x512xf32>, i32 -> vector<8x512xf32>
    %124 = vector.extract_strided_slice %7 {offsets = [3, 0], sizes = [1, 512], strides = [1, 1]} : vector<9x512xf32> to vector<1x512xf32>
    %125 = vector.broadcast %124 : vector<1x512xf32> to vector<8x512xf32>
    %126 = arith.mulf %123, %125 : vector<8x512xf32>
    %c24_70 = arith.constant 24 : index
    %c0_71 = arith.constant 0 : index
    %127 = vector.load %arg10[%c24_70, %c0_71] : memref<72x512xf32, #tpu.memory_space<vmem>>, vector<8x512xf32>
    tpu.vector_store %arg10[%c24_70, %c0_71], %126 {strides = array<i32>} : memref<72x512xf32, #tpu.memory_space<vmem>>, vector<8x512xf32>,
    %c32_72 = arith.constant 32 : index
    %c0_73 = arith.constant 0 : index
    %128 = vector.load %arg10[%c32_72, %c0_73] : memref<72x512xf32, #tpu.memory_space<vmem>>, vector<8x512xf32>
    tpu.vector_store %arg10[%c32_72, %c0_73], %107 {strides = array<i32>} : memref<72x512xf32, #tpu.memory_space<vmem>>, vector<8x512xf32>,
    %c511_i32_74 = arith.constant 511 : i32
    %129 = tpu.dynamic_rotate %107 by %c511_i32_74 dim 1 : vector<8x512xf32>, i32 -> vector<8x512xf32>
    %130 = vector.extract_strided_slice %7 {offsets = [5, 0], sizes = [1, 512], strides = [1, 1]} : vector<9x512xf32> to vector<1x512xf32>
    %131 = vector.broadcast %130 : vector<1x512xf32> to vector<8x512xf32>
    %132 = arith.mulf %129, %131 : vector<8x512xf32>
    %c40_75 = arith.constant 40 : index
    %c0_76 = arith.constant 0 : index
    %133 = vector.load %arg10[%c40_75, %c0_76] : memref<72x512xf32, #tpu.memory_space<vmem>>, vector<8x512xf32>
    tpu.vector_store %arg10[%c40_75, %c0_76], %132 {strides = array<i32>} : memref<72x512xf32, #tpu.memory_space<vmem>>, vector<8x512xf32>,
    %c497_i32_77 = arith.constant 497 : i32
    %134 = tpu.dynamic_rotate %107 by %c497_i32_77 dim 1 : vector<8x512xf32>, i32 -> vector<8x512xf32>
    %135 = vector.extract_strided_slice %7 {offsets = [6, 0], sizes = [1, 512], strides = [1, 1]} : vector<9x512xf32> to vector<1x512xf32>
    %136 = vector.broadcast %135 : vector<1x512xf32> to vector<8x512xf32>
    %137 = arith.mulf %134, %136 : vector<8x512xf32>
    %c48_78 = arith.constant 48 : index
    %c0_79 = arith.constant 0 : index
    %138 = vector.load %arg10[%c48_78, %c0_79] : memref<72x512xf32, #tpu.memory_space<vmem>>, vector<8x512xf32>
    tpu.vector_store %arg10[%c48_78, %c0_79], %137 {strides = array<i32>} : memref<72x512xf32, #tpu.memory_space<vmem>>, vector<8x512xf32>,
    %c496_i32_80 = arith.constant 496 : i32
    %139 = tpu.dynamic_rotate %107 by %c496_i32_80 dim 1 : vector<8x512xf32>, i32 -> vector<8x512xf32>
    %140 = vector.extract_strided_slice %7 {offsets = [7, 0], sizes = [1, 512], strides = [1, 1]} : vector<9x512xf32> to vector<1x512xf32>
    %141 = vector.broadcast %140 : vector<1x512xf32> to vector<8x512xf32>
    %142 = arith.mulf %139, %141 : vector<8x512xf32>
    %c56_81 = arith.constant 56 : index
    %c0_82 = arith.constant 0 : index
    %143 = vector.load %arg10[%c56_81, %c0_82] : memref<72x512xf32, #tpu.memory_space<vmem>>, vector<8x512xf32>
    tpu.vector_store %arg10[%c56_81, %c0_82], %142 {strides = array<i32>} : memref<72x512xf32, #tpu.memory_space<vmem>>, vector<8x512xf32>,
    %c495_i32_83 = arith.constant 495 : i32
    %144 = tpu.dynamic_rotate %107 by %c495_i32_83 dim 1 : vector<8x512xf32>, i32 -> vector<8x512xf32>
    %145 = vector.extract_strided_slice %7 {offsets = [8, 0], sizes = [1, 512], strides = [1, 1]} : vector<9x512xf32> to vector<1x512xf32>
    %146 = vector.broadcast %145 : vector<1x512xf32> to vector<8x512xf32>
    %147 = arith.mulf %144, %146 : vector<8x512xf32>
    %c64_84 = arith.constant 64 : index
    %c0_85 = arith.constant 0 : index
    %148 = vector.load %arg10[%c64_84, %c0_85] : memref<72x512xf32, #tpu.memory_space<vmem>>, vector<8x512xf32>
    tpu.vector_store %arg10[%c64_84, %c0_85], %147 {strides = array<i32>} : memref<72x512xf32, #tpu.memory_space<vmem>>, vector<8x512xf32>,
    %c0_86 = arith.constant 0 : index
    %c0_87 = arith.constant 0 : index
    %149 = vector.load %arg5[%c0_86, %c0_87] : memref<8x72xf32, #tpu.memory_space<vmem>>, vector<8x72xf32>
    %c0_88 = arith.constant 0 : index
    %c0_89 = arith.constant 0 : index
    %150 = vector.load %arg10[%c0_88, %c0_89] : memref<72x512xf32, #tpu.memory_space<vmem>>, vector<72x512xf32>
    %cst_90 = arith.constant dense<0.000000e+00> : vector<8x512xf32>
    %151 = tpu.matmul %149, %150, %cst_90 {dimension_numbers = #tpu.dot_dimension_numbers<[1], [0], [0], [1], [0, 0, 1, 1], [], []>} : vector<8x72xf32>, vector<72x512xf32>, vector<8x512xf32> -> vector<8x512xf32>
    %c0_91 = arith.constant 0 : index
    %c0_92 = arith.constant 0 : index
    %152 = vector.load %arg6[%c0_91, %c0_92] : memref<8x1xf32, #tpu.memory_space<vmem>>, vector<8x1xf32>
    %153 = vector.broadcast %152 : vector<8x1xf32> to vector<8x512xf32>
    %154 = arith.addf %151, %153 : vector<8x512xf32>
    %cst_93 = arith.constant 0.000000e+00 : f32
    %155 = vector.broadcast %cst_93 : f32 to vector<8x512xf32>
    %156 = arith.maximumf %154, %155 : vector<8x512xf32>
    %c17_i32_94 = arith.constant 17 : i32
    %157 = tpu.dynamic_rotate %156 by %c17_i32_94 dim 1 : vector<8x512xf32>, i32 -> vector<8x512xf32>
    %158 = vector.extract_strided_slice %7 {offsets = [0, 0], sizes = [1, 512], strides = [1, 1]} : vector<9x512xf32> to vector<1x512xf32>
    %159 = vector.broadcast %158 : vector<1x512xf32> to vector<8x512xf32>
    %160 = arith.mulf %157, %159 : vector<8x512xf32>
    %c0_95 = arith.constant 0 : index
    %c0_96 = arith.constant 0 : index
    %161 = vector.load %arg10[%c0_95, %c0_96] : memref<72x512xf32, #tpu.memory_space<vmem>>, vector<8x512xf32>
    tpu.vector_store %arg10[%c0_95, %c0_96], %160 {strides = array<i32>} : memref<72x512xf32, #tpu.memory_space<vmem>>, vector<8x512xf32>,
    %c16_i32_97 = arith.constant 16 : i32
    %162 = tpu.dynamic_rotate %156 by %c16_i32_97 dim 1 : vector<8x512xf32>, i32 -> vector<8x512xf32>
    %163 = vector.extract_strided_slice %7 {offsets = [1, 0], sizes = [1, 512], strides = [1, 1]} : vector<9x512xf32> to vector<1x512xf32>
    %164 = vector.broadcast %163 : vector<1x512xf32> to vector<8x512xf32>
    %165 = arith.mulf %162, %164 : vector<8x512xf32>
    %c8_98 = arith.constant 8 : index
    %c0_99 = arith.constant 0 : index
    %166 = vector.load %arg10[%c8_98, %c0_99] : memref<72x512xf32, #tpu.memory_space<vmem>>, vector<8x512xf32>
    tpu.vector_store %arg10[%c8_98, %c0_99], %165 {strides = array<i32>} : memref<72x512xf32, #tpu.memory_space<vmem>>, vector<8x512xf32>,
    %c15_i32_100 = arith.constant 15 : i32
    %167 = tpu.dynamic_rotate %156 by %c15_i32_100 dim 1 : vector<8x512xf32>, i32 -> vector<8x512xf32>
    %168 = vector.extract_strided_slice %7 {offsets = [2, 0], sizes = [1, 512], strides = [1, 1]} : vector<9x512xf32> to vector<1x512xf32>
    %169 = vector.broadcast %168 : vector<1x512xf32> to vector<8x512xf32>
    %170 = arith.mulf %167, %169 : vector<8x512xf32>
    %c16_101 = arith.constant 16 : index
    %c0_102 = arith.constant 0 : index
    %171 = vector.load %arg10[%c16_101, %c0_102] : memref<72x512xf32, #tpu.memory_space<vmem>>, vector<8x512xf32>
    tpu.vector_store %arg10[%c16_101, %c0_102], %170 {strides = array<i32>} : memref<72x512xf32, #tpu.memory_space<vmem>>, vector<8x512xf32>,
    %c1_i32_103 = arith.constant 1 : i32
    %172 = tpu.dynamic_rotate %156 by %c1_i32_103 dim 1 : vector<8x512xf32>, i32 -> vector<8x512xf32>
    %173 = vector.extract_strided_slice %7 {offsets = [3, 0], sizes = [1, 512], strides = [1, 1]} : vector<9x512xf32> to vector<1x512xf32>
    %174 = vector.broadcast %173 : vector<1x512xf32> to vector<8x512xf32>
    %175 = arith.mulf %172, %174 : vector<8x512xf32>
    %c24_104 = arith.constant 24 : index
    %c0_105 = arith.constant 0 : index
    %176 = vector.load %arg10[%c24_104, %c0_105] : memref<72x512xf32, #tpu.memory_space<vmem>>, vector<8x512xf32>
    tpu.vector_store %arg10[%c24_104, %c0_105], %175 {strides = array<i32>} : memref<72x512xf32, #tpu.memory_space<vmem>>, vector<8x512xf32>,
    %c32_106 = arith.constant 32 : index
    %c0_107 = arith.constant 0 : index
    %177 = vector.load %arg10[%c32_106, %c0_107] : memref<72x512xf32, #tpu.memory_space<vmem>>, vector<8x512xf32>
    tpu.vector_store %arg10[%c32_106, %c0_107], %156 {strides = array<i32>} : memref<72x512xf32, #tpu.memory_space<vmem>>, vector<8x512xf32>,
    %c511_i32_108 = arith.constant 511 : i32
    %178 = tpu.dynamic_rotate %156 by %c511_i32_108 dim 1 : vector<8x512xf32>, i32 -> vector<8x512xf32>
    %179 = vector.extract_strided_slice %7 {offsets = [5, 0], sizes = [1, 512], strides = [1, 1]} : vector<9x512xf32> to vector<1x512xf32>
    %180 = vector.broadcast %179 : vector<1x512xf32> to vector<8x512xf32>
    %181 = arith.mulf %178, %180 : vector<8x512xf32>
    %c40_109 = arith.constant 40 : index
    %c0_110 = arith.constant 0 : index
    %182 = vector.load %arg10[%c40_109, %c0_110] : memref<72x512xf32, #tpu.memory_space<vmem>>, vector<8x512xf32>
    tpu.vector_store %arg10[%c40_109, %c0_110], %181 {strides = array<i32>} : memref<72x512xf32, #tpu.memory_space<vmem>>, vector<8x512xf32>,
    %c497_i32_111 = arith.constant 497 : i32
    %183 = tpu.dynamic_rotate %156 by %c497_i32_111 dim 1 : vector<8x512xf32>, i32 -> vector<8x512xf32>
    %184 = vector.extract_strided_slice %7 {offsets = [6, 0], sizes = [1, 512], strides = [1, 1]} : vector<9x512xf32> to vector<1x512xf32>
    %185 = vector.broadcast %184 : vector<1x512xf32> to vector<8x512xf32>
    %186 = arith.mulf %183, %185 : vector<8x512xf32>
    %c48_112 = arith.constant 48 : index
    %c0_113 = arith.constant 0 : index
    %187 = vector.load %arg10[%c48_112, %c0_113] : memref<72x512xf32, #tpu.memory_space<vmem>>, vector<8x512xf32>
    tpu.vector_store %arg10[%c48_112, %c0_113], %186 {strides = array<i32>} : memref<72x512xf32, #tpu.memory_space<vmem>>, vector<8x512xf32>,
    %c496_i32_114 = arith.constant 496 : i32
    %188 = tpu.dynamic_rotate %156 by %c496_i32_114 dim 1 : vector<8x512xf32>, i32 -> vector<8x512xf32>
    %189 = vector.extract_strided_slice %7 {offsets = [7, 0], sizes = [1, 512], strides = [1, 1]} : vector<9x512xf32> to vector<1x512xf32>
    %190 = vector.broadcast %189 : vector<1x512xf32> to vector<8x512xf32>
    %191 = arith.mulf %188, %190 : vector<8x512xf32>
    %c56_115 = arith.constant 56 : index
    %c0_116 = arith.constant 0 : index
    %192 = vector.load %arg10[%c56_115, %c0_116] : memref<72x512xf32, #tpu.memory_space<vmem>>, vector<8x512xf32>
    tpu.vector_store %arg10[%c56_115, %c0_116], %191 {strides = array<i32>} : memref<72x512xf32, #tpu.memory_space<vmem>>, vector<8x512xf32>,
    %c495_i32_117 = arith.constant 495 : i32
    %193 = tpu.dynamic_rotate %156 by %c495_i32_117 dim 1 : vector<8x512xf32>, i32 -> vector<8x512xf32>
    %194 = vector.extract_strided_slice %7 {offsets = [8, 0], sizes = [1, 512], strides = [1, 1]} : vector<9x512xf32> to vector<1x512xf32>
    %195 = vector.broadcast %194 : vector<1x512xf32> to vector<8x512xf32>
    %196 = arith.mulf %193, %195 : vector<8x512xf32>
    %c64_118 = arith.constant 64 : index
    %c0_119 = arith.constant 0 : index
    %197 = vector.load %arg10[%c64_118, %c0_119] : memref<72x512xf32, #tpu.memory_space<vmem>>, vector<8x512xf32>
    tpu.vector_store %arg10[%c64_118, %c0_119], %196 {strides = array<i32>} : memref<72x512xf32, #tpu.memory_space<vmem>>, vector<8x512xf32>,
    %c0_120 = arith.constant 0 : index
    %c0_121 = arith.constant 0 : index
    %198 = vector.load %arg7[%c0_120, %c0_121] : memref<8x72xf32, #tpu.memory_space<vmem>>, vector<8x72xf32>
    %c0_122 = arith.constant 0 : index
    %c0_123 = arith.constant 0 : index
    %199 = vector.load %arg10[%c0_122, %c0_123] : memref<72x512xf32, #tpu.memory_space<vmem>>, vector<72x512xf32>
    %cst_124 = arith.constant dense<0.000000e+00> : vector<8x512xf32>
    %200 = tpu.matmul %198, %199, %cst_124 {dimension_numbers = #tpu.dot_dimension_numbers<[1], [0], [0], [1], [0, 0, 1, 1], [], []>} : vector<8x72xf32>, vector<72x512xf32>, vector<8x512xf32> -> vector<8x512xf32>
    %c0_125 = arith.constant 0 : index
    %c0_126 = arith.constant 0 : index
    %201 = vector.load %arg8[%c0_125, %c0_126] : memref<8x1xf32, #tpu.memory_space<vmem>>, vector<8x1xf32>
    %202 = vector.broadcast %201 : vector<8x1xf32> to vector<8x512xf32>
    %203 = arith.addf %200, %202 : vector<8x512xf32>
    %cst_127 = arith.constant 0.000000e+00 : f32
    %204 = vector.broadcast %cst_127 : f32 to vector<8x512xf32>
    %205 = arith.maximumf %203, %204 : vector<8x512xf32>
    %206 = arith.addf %156, %205 : vector<8x512xf32>
    %c17_i32_128 = arith.constant 17 : i32
    %207 = tpu.dynamic_rotate %206 by %c17_i32_128 dim 1 : vector<8x512xf32>, i32 -> vector<8x512xf32>
    %208 = vector.extract_strided_slice %7 {offsets = [0, 0], sizes = [1, 512], strides = [1, 1]} : vector<9x512xf32> to vector<1x512xf32>
    %209 = vector.broadcast %208 : vector<1x512xf32> to vector<8x512xf32>
    %210 = arith.mulf %207, %209 : vector<8x512xf32>
    %c0_129 = arith.constant 0 : index
    %c0_130 = arith.constant 0 : index
    %211 = vector.load %arg10[%c0_129, %c0_130] : memref<72x512xf32, #tpu.memory_space<vmem>>, vector<8x512xf32>
    tpu.vector_store %arg10[%c0_129, %c0_130], %210 {strides = array<i32>} : memref<72x512xf32, #tpu.memory_space<vmem>>, vector<8x512xf32>,
    %c16_i32_131 = arith.constant 16 : i32
    %212 = tpu.dynamic_rotate %206 by %c16_i32_131 dim 1 : vector<8x512xf32>, i32 -> vector<8x512xf32>
    %213 = vector.extract_strided_slice %7 {offsets = [1, 0], sizes = [1, 512], strides = [1, 1]} : vector<9x512xf32> to vector<1x512xf32>
    %214 = vector.broadcast %213 : vector<1x512xf32> to vector<8x512xf32>
    %215 = arith.mulf %212, %214 : vector<8x512xf32>
    %c8_132 = arith.constant 8 : index
    %c0_133 = arith.constant 0 : index
    %216 = vector.load %arg10[%c8_132, %c0_133] : memref<72x512xf32, #tpu.memory_space<vmem>>, vector<8x512xf32>
    tpu.vector_store %arg10[%c8_132, %c0_133], %215 {strides = array<i32>} : memref<72x512xf32, #tpu.memory_space<vmem>>, vector<8x512xf32>,
    %c15_i32_134 = arith.constant 15 : i32
    %217 = tpu.dynamic_rotate %206 by %c15_i32_134 dim 1 : vector<8x512xf32>, i32 -> vector<8x512xf32>
    %218 = vector.extract_strided_slice %7 {offsets = [2, 0], sizes = [1, 512], strides = [1, 1]} : vector<9x512xf32> to vector<1x512xf32>
    %219 = vector.broadcast %218 : vector<1x512xf32> to vector<8x512xf32>
    %220 = arith.mulf %217, %219 : vector<8x512xf32>
    %c16_135 = arith.constant 16 : index
    %c0_136 = arith.constant 0 : index
    %221 = vector.load %arg10[%c16_135, %c0_136] : memref<72x512xf32, #tpu.memory_space<vmem>>, vector<8x512xf32>
    tpu.vector_store %arg10[%c16_135, %c0_136], %220 {strides = array<i32>} : memref<72x512xf32, #tpu.memory_space<vmem>>, vector<8x512xf32>,
    %c1_i32_137 = arith.constant 1 : i32
    %222 = tpu.dynamic_rotate %206 by %c1_i32_137 dim 1 : vector<8x512xf32>, i32 -> vector<8x512xf32>
    %223 = vector.extract_strided_slice %7 {offsets = [3, 0], sizes = [1, 512], strides = [1, 1]} : vector<9x512xf32> to vector<1x512xf32>
    %224 = vector.broadcast %223 : vector<1x512xf32> to vector<8x512xf32>
    %225 = arith.mulf %222, %224 : vector<8x512xf32>
    %c24_138 = arith.constant 24 : index
    %c0_139 = arith.constant 0 : index
    %226 = vector.load %arg10[%c24_138, %c0_139] : memref<72x512xf32, #tpu.memory_space<vmem>>, vector<8x512xf32>
    tpu.vector_store %arg10[%c24_138, %c0_139], %225 {strides = array<i32>} : memref<72x512xf32, #tpu.memory_space<vmem>>, vector<8x512xf32>,
    %c32_140 = arith.constant 32 : index
    %c0_141 = arith.constant 0 : index
    %227 = vector.load %arg10[%c32_140, %c0_141] : memref<72x512xf32, #tpu.memory_space<vmem>>, vector<8x512xf32>
    tpu.vector_store %arg10[%c32_140, %c0_141], %206 {strides = array<i32>} : memref<72x512xf32, #tpu.memory_space<vmem>>, vector<8x512xf32>,
    %c511_i32_142 = arith.constant 511 : i32
    %228 = tpu.dynamic_rotate %206 by %c511_i32_142 dim 1 : vector<8x512xf32>, i32 -> vector<8x512xf32>
    %229 = vector.extract_strided_slice %7 {offsets = [5, 0], sizes = [1, 512], strides = [1, 1]} : vector<9x512xf32> to vector<1x512xf32>
    %230 = vector.broadcast %229 : vector<1x512xf32> to vector<8x512xf32>
    %231 = arith.mulf %228, %230 : vector<8x512xf32>
    %c40_143 = arith.constant 40 : index
    %c0_144 = arith.constant 0 : index
    %232 = vector.load %arg10[%c40_143, %c0_144] : memref<72x512xf32, #tpu.memory_space<vmem>>, vector<8x512xf32>
    tpu.vector_store %arg10[%c40_143, %c0_144], %231 {strides = array<i32>} : memref<72x512xf32, #tpu.memory_space<vmem>>, vector<8x512xf32>,
    %c497_i32_145 = arith.constant 497 : i32
    %233 = tpu.dynamic_rotate %206 by %c497_i32_145 dim 1 : vector<8x512xf32>, i32 -> vector<8x512xf32>
    %234 = vector.extract_strided_slice %7 {offsets = [6, 0], sizes = [1, 512], strides = [1, 1]} : vector<9x512xf32> to vector<1x512xf32>
    %235 = vector.broadcast %234 : vector<1x512xf32> to vector<8x512xf32>
    %236 = arith.mulf %233, %235 : vector<8x512xf32>
    %c48_146 = arith.constant 48 : index
    %c0_147 = arith.constant 0 : index
    %237 = vector.load %arg10[%c48_146, %c0_147] : memref<72x512xf32, #tpu.memory_space<vmem>>, vector<8x512xf32>
    tpu.vector_store %arg10[%c48_146, %c0_147], %236 {strides = array<i32>} : memref<72x512xf32, #tpu.memory_space<vmem>>, vector<8x512xf32>,
    %c496_i32_148 = arith.constant 496 : i32
    %238 = tpu.dynamic_rotate %206 by %c496_i32_148 dim 1 : vector<8x512xf32>, i32 -> vector<8x512xf32>
    %239 = vector.extract_strided_slice %7 {offsets = [7, 0], sizes = [1, 512], strides = [1, 1]} : vector<9x512xf32> to vector<1x512xf32>
    %240 = vector.broadcast %239 : vector<1x512xf32> to vector<8x512xf32>
    %241 = arith.mulf %238, %240 : vector<8x512xf32>
    %c56_149 = arith.constant 56 : index
    %c0_150 = arith.constant 0 : index
    %242 = vector.load %arg10[%c56_149, %c0_150] : memref<72x512xf32, #tpu.memory_space<vmem>>, vector<8x512xf32>
    tpu.vector_store %arg10[%c56_149, %c0_150], %241 {strides = array<i32>} : memref<72x512xf32, #tpu.memory_space<vmem>>, vector<8x512xf32>,
    %c495_i32_151 = arith.constant 495 : i32
    %243 = tpu.dynamic_rotate %206 by %c495_i32_151 dim 1 : vector<8x512xf32>, i32 -> vector<8x512xf32>
    %244 = vector.extract_strided_slice %7 {offsets = [8, 0], sizes = [1, 512], strides = [1, 1]} : vector<9x512xf32> to vector<1x512xf32>
    %245 = vector.broadcast %244 : vector<1x512xf32> to vector<8x512xf32>
    %246 = arith.mulf %243, %245 : vector<8x512xf32>
    %c64_152 = arith.constant 64 : index
    %c0_153 = arith.constant 0 : index
    %247 = vector.load %arg10[%c64_152, %c0_153] : memref<72x512xf32, #tpu.memory_space<vmem>>, vector<8x512xf32>
    tpu.vector_store %arg10[%c64_152, %c0_153], %246 {strides = array<i32>} : memref<72x512xf32, #tpu.memory_space<vmem>>, vector<8x512xf32>,
    %c0_154 = arith.constant 0 : index
    %c0_155 = arith.constant 0 : index
    %248 = vector.load %arg7[%c0_154, %c0_155] : memref<8x72xf32, #tpu.memory_space<vmem>>, vector<8x72xf32>
    %c0_156 = arith.constant 0 : index
    %c0_157 = arith.constant 0 : index
    %249 = vector.load %arg10[%c0_156, %c0_157] : memref<72x512xf32, #tpu.memory_space<vmem>>, vector<72x512xf32>
    %cst_158 = arith.constant dense<0.000000e+00> : vector<8x512xf32>
    %250 = tpu.matmul %248, %249, %cst_158 {dimension_numbers = #tpu.dot_dimension_numbers<[1], [0], [0], [1], [0, 0, 1, 1], [], []>} : vector<8x72xf32>, vector<72x512xf32>, vector<8x512xf32> -> vector<8x512xf32>
    %c0_159 = arith.constant 0 : index
    %c0_160 = arith.constant 0 : index
    %251 = vector.load %arg8[%c0_159, %c0_160] : memref<8x1xf32, #tpu.memory_space<vmem>>, vector<8x1xf32>
    %252 = vector.broadcast %251 : vector<8x1xf32> to vector<8x512xf32>
    %253 = arith.addf %250, %252 : vector<8x512xf32>
    %cst_161 = arith.constant 0.000000e+00 : f32
    %254 = vector.broadcast %cst_161 : f32 to vector<8x512xf32>
    %255 = arith.maximumf %253, %254 : vector<8x512xf32>
    %256 = arith.addf %156, %255 : vector<8x512xf32>
    %c17_i32_162 = arith.constant 17 : i32
    %257 = tpu.dynamic_rotate %256 by %c17_i32_162 dim 1 : vector<8x512xf32>, i32 -> vector<8x512xf32>
    %258 = vector.extract_strided_slice %7 {offsets = [0, 0], sizes = [1, 512], strides = [1, 1]} : vector<9x512xf32> to vector<1x512xf32>
    %259 = vector.broadcast %258 : vector<1x512xf32> to vector<8x512xf32>
    %260 = arith.mulf %257, %259 : vector<8x512xf32>
    %c0_163 = arith.constant 0 : index
    %c0_164 = arith.constant 0 : index
    %261 = vector.load %arg10[%c0_163, %c0_164] : memref<72x512xf32, #tpu.memory_space<vmem>>, vector<8x512xf32>
    tpu.vector_store %arg10[%c0_163, %c0_164], %260 {strides = array<i32>} : memref<72x512xf32, #tpu.memory_space<vmem>>, vector<8x512xf32>,
    %c16_i32_165 = arith.constant 16 : i32
    %262 = tpu.dynamic_rotate %256 by %c16_i32_165 dim 1 : vector<8x512xf32>, i32 -> vector<8x512xf32>
    %263 = vector.extract_strided_slice %7 {offsets = [1, 0], sizes = [1, 512], strides = [1, 1]} : vector<9x512xf32> to vector<1x512xf32>
    %264 = vector.broadcast %263 : vector<1x512xf32> to vector<8x512xf32>
    %265 = arith.mulf %262, %264 : vector<8x512xf32>
    %c8_166 = arith.constant 8 : index
    %c0_167 = arith.constant 0 : index
    %266 = vector.load %arg10[%c8_166, %c0_167] : memref<72x512xf32, #tpu.memory_space<vmem>>, vector<8x512xf32>
    tpu.vector_store %arg10[%c8_166, %c0_167], %265 {strides = array<i32>} : memref<72x512xf32, #tpu.memory_space<vmem>>, vector<8x512xf32>,
    %c15_i32_168 = arith.constant 15 : i32
    %267 = tpu.dynamic_rotate %256 by %c15_i32_168 dim 1 : vector<8x512xf32>, i32 -> vector<8x512xf32>
    %268 = vector.extract_strided_slice %7 {offsets = [2, 0], sizes = [1, 512], strides = [1, 1]} : vector<9x512xf32> to vector<1x512xf32>
    %269 = vector.broadcast %268 : vector<1x512xf32> to vector<8x512xf32>
    %270 = arith.mulf %267, %269 : vector<8x512xf32>
    %c16_169 = arith.constant 16 : index
    %c0_170 = arith.constant 0 : index
    %271 = vector.load %arg10[%c16_169, %c0_170] : memref<72x512xf32, #tpu.memory_space<vmem>>, vector<8x512xf32>
    tpu.vector_store %arg10[%c16_169, %c0_170], %270 {strides = array<i32>} : memref<72x512xf32, #tpu.memory_space<vmem>>, vector<8x512xf32>,
    %c1_i32_171 = arith.constant 1 : i32
    %272 = tpu.dynamic_rotate %256 by %c1_i32_171 dim 1 : vector<8x512xf32>, i32 -> vector<8x512xf32>
    %273 = vector.extract_strided_slice %7 {offsets = [3, 0], sizes = [1, 512], strides = [1, 1]} : vector<9x512xf32> to vector<1x512xf32>
    %274 = vector.broadcast %273 : vector<1x512xf32> to vector<8x512xf32>
    %275 = arith.mulf %272, %274 : vector<8x512xf32>
    %c24_172 = arith.constant 24 : index
    %c0_173 = arith.constant 0 : index
    %276 = vector.load %arg10[%c24_172, %c0_173] : memref<72x512xf32, #tpu.memory_space<vmem>>, vector<8x512xf32>
    tpu.vector_store %arg10[%c24_172, %c0_173], %275 {strides = array<i32>} : memref<72x512xf32, #tpu.memory_space<vmem>>, vector<8x512xf32>,
    %c32_174 = arith.constant 32 : index
    %c0_175 = arith.constant 0 : index
    %277 = vector.load %arg10[%c32_174, %c0_175] : memref<72x512xf32, #tpu.memory_space<vmem>>, vector<8x512xf32>
    tpu.vector_store %arg10[%c32_174, %c0_175], %256 {strides = array<i32>} : memref<72x512xf32, #tpu.memory_space<vmem>>, vector<8x512xf32>,
    %c511_i32_176 = arith.constant 511 : i32
    %278 = tpu.dynamic_rotate %256 by %c511_i32_176 dim 1 : vector<8x512xf32>, i32 -> vector<8x512xf32>
    %279 = vector.extract_strided_slice %7 {offsets = [5, 0], sizes = [1, 512], strides = [1, 1]} : vector<9x512xf32> to vector<1x512xf32>
    %280 = vector.broadcast %279 : vector<1x512xf32> to vector<8x512xf32>
    %281 = arith.mulf %278, %280 : vector<8x512xf32>
    %c40_177 = arith.constant 40 : index
    %c0_178 = arith.constant 0 : index
    %282 = vector.load %arg10[%c40_177, %c0_178] : memref<72x512xf32, #tpu.memory_space<vmem>>, vector<8x512xf32>
    tpu.vector_store %arg10[%c40_177, %c0_178], %281 {strides = array<i32>} : memref<72x512xf32, #tpu.memory_space<vmem>>, vector<8x512xf32>,
    %c497_i32_179 = arith.constant 497 : i32
    %283 = tpu.dynamic_rotate %256 by %c497_i32_179 dim 1 : vector<8x512xf32>, i32 -> vector<8x512xf32>
    %284 = vector.extract_strided_slice %7 {offsets = [6, 0], sizes = [1, 512], strides = [1, 1]} : vector<9x512xf32> to vector<1x512xf32>
    %285 = vector.broadcast %284 : vector<1x512xf32> to vector<8x512xf32>
    %286 = arith.mulf %283, %285 : vector<8x512xf32>
    %c48_180 = arith.constant 48 : index
    %c0_181 = arith.constant 0 : index
    %287 = vector.load %arg10[%c48_180, %c0_181] : memref<72x512xf32, #tpu.memory_space<vmem>>, vector<8x512xf32>
    tpu.vector_store %arg10[%c48_180, %c0_181], %286 {strides = array<i32>} : memref<72x512xf32, #tpu.memory_space<vmem>>, vector<8x512xf32>,
    %c496_i32_182 = arith.constant 496 : i32
    %288 = tpu.dynamic_rotate %256 by %c496_i32_182 dim 1 : vector<8x512xf32>, i32 -> vector<8x512xf32>
    %289 = vector.extract_strided_slice %7 {offsets = [7, 0], sizes = [1, 512], strides = [1, 1]} : vector<9x512xf32> to vector<1x512xf32>
    %290 = vector.broadcast %289 : vector<1x512xf32> to vector<8x512xf32>
    %291 = arith.mulf %288, %290 : vector<8x512xf32>
    %c56_183 = arith.constant 56 : index
    %c0_184 = arith.constant 0 : index
    %292 = vector.load %arg10[%c56_183, %c0_184] : memref<72x512xf32, #tpu.memory_space<vmem>>, vector<8x512xf32>
    tpu.vector_store %arg10[%c56_183, %c0_184], %291 {strides = array<i32>} : memref<72x512xf32, #tpu.memory_space<vmem>>, vector<8x512xf32>,
    %c495_i32_185 = arith.constant 495 : i32
    %293 = tpu.dynamic_rotate %256 by %c495_i32_185 dim 1 : vector<8x512xf32>, i32 -> vector<8x512xf32>
    %294 = vector.extract_strided_slice %7 {offsets = [8, 0], sizes = [1, 512], strides = [1, 1]} : vector<9x512xf32> to vector<1x512xf32>
    %295 = vector.broadcast %294 : vector<1x512xf32> to vector<8x512xf32>
    %296 = arith.mulf %293, %295 : vector<8x512xf32>
    %c64_186 = arith.constant 64 : index
    %c0_187 = arith.constant 0 : index
    %297 = vector.load %arg10[%c64_186, %c0_187] : memref<72x512xf32, #tpu.memory_space<vmem>>, vector<8x512xf32>
    tpu.vector_store %arg10[%c64_186, %c0_187], %296 {strides = array<i32>} : memref<72x512xf32, #tpu.memory_space<vmem>>, vector<8x512xf32>,
    %c0_188 = arith.constant 0 : index
    %c0_189 = arith.constant 0 : index
    %298 = vector.load %arg7[%c0_188, %c0_189] : memref<8x72xf32, #tpu.memory_space<vmem>>, vector<8x72xf32>
    %c0_190 = arith.constant 0 : index
    %c0_191 = arith.constant 0 : index
    %299 = vector.load %arg10[%c0_190, %c0_191] : memref<72x512xf32, #tpu.memory_space<vmem>>, vector<72x512xf32>
    %cst_192 = arith.constant dense<0.000000e+00> : vector<8x512xf32>
    %300 = tpu.matmul %298, %299, %cst_192 {dimension_numbers = #tpu.dot_dimension_numbers<[1], [0], [0], [1], [0, 0, 1, 1], [], []>} : vector<8x72xf32>, vector<72x512xf32>, vector<8x512xf32> -> vector<8x512xf32>
    %c0_193 = arith.constant 0 : index
    %c0_194 = arith.constant 0 : index
    %301 = vector.load %arg8[%c0_193, %c0_194] : memref<8x1xf32, #tpu.memory_space<vmem>>, vector<8x1xf32>
    %302 = vector.broadcast %301 : vector<8x1xf32> to vector<8x512xf32>
    %303 = arith.addf %300, %302 : vector<8x512xf32>
    %cst_195 = arith.constant 0.000000e+00 : f32
    %304 = vector.broadcast %cst_195 : f32 to vector<8x512xf32>
    %305 = arith.maximumf %303, %304 : vector<8x512xf32>
    %306 = arith.addf %6, %305 : vector<8x512xf32>
    %c0_196 = arith.constant 0 : index
    %c0_197 = arith.constant 0 : index
    %c0_198 = arith.constant 0 : index
    %307 = vector.load %arg9[%c0_196, %c0_197, %c0_198] : memref<1x8x512xf32, #tpu.memory_space<vmem>>, vector<1x8x512xf32>
    %308 = vector.shape_cast %307 : vector<1x8x512xf32> to vector<8x512xf32>
    %309 = vector.shape_cast %306 : vector<8x512xf32> to vector<1x8x512xf32>
    tpu.vector_store %arg9[%c0_196, %c0_197, %c0_198], %309 {strides = array<i32>} : memref<1x8x512xf32, #tpu.memory_space<vmem>>, vector<1x8x512xf32>,
    return
  }
  func.func @transform_0(%arg0: i32) -> (i32, i32, i32) {
    %c0_i32 = arith.constant 0 : i32
    %c0_i32_0 = arith.constant 0 : i32
    %c0_i32_1 = arith.constant 0 : i32
    return %arg0, %c0_i32, %c0_i32_0 : i32, i32, i32
  }
  func.func @transform_1(%arg0: i32) -> (i32, i32) {
    %c0_i32 = arith.constant 0 : i32
    %c0_i32_0 = arith.constant 0 : i32
    %c0_i32_1 = arith.constant 0 : i32
    return %c0_i32, %c0_i32_0 : i32, i32
  }
  func.func @transform_2(%arg0: i32) -> (i32, i32) {
    %c0_i32 = arith.constant 0 : i32
    %c0_i32_0 = arith.constant 0 : i32
    %c0_i32_1 = arith.constant 0 : i32
    return %c0_i32, %c0_i32_0 : i32, i32
  }
  func.func @transform_3(%arg0: i32) -> (i32, i32) {
    %c0_i32 = arith.constant 0 : i32
    %c0_i32_0 = arith.constant 0 : i32
    %c0_i32_1 = arith.constant 0 : i32
    return %c0_i32, %c0_i32_0 : i32, i32
  }
  func.func @transform_4(%arg0: i32) -> (i32, i32) {
    %c0_i32 = arith.constant 0 : i32
    %c0_i32_0 = arith.constant 0 : i32
    %c0_i32_1 = arith.constant 0 : i32
    return %c0_i32, %c0_i32_0 : i32, i32
  }
  func.func @transform_5(%arg0: i32) -> (i32, i32) {
    %c0_i32 = arith.constant 0 : i32
    %c0_i32_0 = arith.constant 0 : i32
    %c0_i32_1 = arith.constant 0 : i32
    return %c0_i32, %c0_i32_0 : i32, i32
  }
  func.func @transform_6(%arg0: i32) -> (i32, i32) {
    %c0_i32 = arith.constant 0 : i32
    %c0_i32_0 = arith.constant 0 : i32
    %c0_i32_1 = arith.constant 0 : i32
    return %c0_i32, %c0_i32_0 : i32, i32
  }
  func.func @transform_7(%arg0: i32) -> (i32, i32) {
    %c0_i32 = arith.constant 0 : i32
    %c0_i32_0 = arith.constant 0 : i32
    %c0_i32_1 = arith.constant 0 : i32
    return %c0_i32, %c0_i32_0 : i32, i32
  }
  func.func @transform_8(%arg0: i32) -> (i32, i32, i32) {
    %c0_i32 = arith.constant 0 : i32
    %c0_i32_0 = arith.constant 0 : i32
    %c0_i32_1 = arith.constant 0 : i32
    return %arg0, %c0_i32, %c0_i32_0 : i32, i32, i32
  }
}

</mosaic_0001>

<bundles_post_ra>
// kernel: tpu_custom_call.1
= control target key start
LH: loop header
LB: loop body
LE: loop exit
PB: predicated region body
PF: predicated region fallthrough
CT: control target
= control target key end

     0   :  { %13 = vsyncpa [#allocation4], 0  ;;  %s3555_s0 = inlined_call_operand.vmem [shape: f32[1,4,512], index: 0, kind: input, shape index: {}]   ;;  %s3556_s1 = inlined_call_operand.hbm [shape: f32[9,512], index: 1, kind: input, shape index: {}]   ;;  %s3557_s2 = inlined_call_operand.vmem [shape: f32[8,4], index: 2, kind: input, shape index: {}]   ;;  %s3558_s3 = inlined_call_operand.vmem [shape: f32[8,1], index: 3, kind: input, shape index: {}]   ;;  %s3559_s4 = inlined_call_operand.vmem [shape: f32[8,72], index: 4, kind: input, shape index: {}]   ;;  %s3560_s5 = inlined_call_operand.vmem [shape: f32[8,1], index: 5, kind: input, shape index: {}]   ;;  %s3561_s6 = inlined_call_operand.vmem [shape: f32[8,72], index: 6, kind: input, shape index: {}]   ;;  %s3562_s7 = inlined_call_operand.vmem [shape: f32[8,1], index: 7, kind: input, shape index: {}]   ;;  %s3563_s8 = inlined_call_operand.hbm [shape: f32[1,8,512], index: 8, kind: output, shape index: {}]  }
   0x1   :  { %14 = vsyncpa [#allocation5], 0  ;;  %s21_s29 = sshll.u32 %s3556_s1, 4  ;;  %s2119_s30 = smov [#allocation3]   ;;  %s22_s29 = int_to_ptr.hbm [resolvable:$true] %s21_s29 }
   0x2   :  { %s23_s9 = sshll.u32 %s2119_s30, 4  ;;  %s2120_s10 = smov 512   ;;  %s24_s9 = int_to_ptr.vmem [resolvable:$true] %s23_s9 }
   0x3   :  { %s2121_s11 = smov 32  }
   0x4   :  { %29 = dma.hbm_to_vmem [thread:$0]  %s22_s29, 1024, %s24_s9, [#allocation4], %s2120_s10, %s2120_s10, %s2121_s11  }
   0x5   :  { %2115 = dma.done.wait [#allocation4], 1024  }
   0x6   :  { %2116 = vsyncadd [#allocation4], 4294966272  ;;  %v2122_v0 = vmov 0   ;;  %v47_v1 = vld [vmem:[%s3555_s0] sm:$0xff]  ;;  %v48_v2 = vld [vmem:[%s3555_s0 + $0x8] sm:$0xff]  ;;  %vm68_vm0 = vcmask 1043456   ;;  %v173_v25 = vlaneseq }
   0x7   :  { %2058 = vset.pattern.permute.xlu0 %v2122_v0  ;;  %57 = vst [vmem:[#allocation1] ss:$2 sm:$0xff] %v47_v1  ;;  %v49_v3 = vld [vmem:[%s3558_s3] sm:$0xff]  ;;  %vm64_vm1 = vcmask 31744   ;;  %s2123_s0 = smov 113   ;;  %s2125_s3 = smov 111  }
   0x8   :  { %59 = vst [vmem:[#allocation1 + $0x10] ss:$2 sm:$0xff] %v48_v2  ;;  %52 = vperm.xlu0 %2058, %v49_v3   ;;  %v46_v4 = vld [vmem:[%s3557_s2] sm:$0xff]  ;;  %s2124_s2 = smov 112   ;;  %s2126_s19 = smov 127   ;;  %v2286_v29 = vand.u32 127, %v173_v25 }
   0x9   :  { %s2127_s20 = smov 1   ;;  %s2128_s21 = smov 16   ;;  %v2263_v18 = vld [vmem:[%s3560_s5] sm:$0xff]  ;;  %v2288_v30 = vld [vmem:[#allocation3] sm:$0xff]  ;;  %v2329_v52 = vld [vmem:[#allocation3 + $0x8] sm:$0xff]  ;;  %vm414_vm10 = vcmask 588800  }
   0xa   :  { %s2129_s22 = smov 15   ;;  %s2130_s23 = smov 17   ;;  %3579 = vst [vmem:[#allocation13_spill] sm:$0xff] %v2263_v18  ;;  %vm354_vm2 = vcmp.lt.s32.totalorder %v2286_v29, 111  ;;  %v2291_v31 = vld [vmem:[#allocation3 + $0x20] ss:$0 sm:$0xff] }
   0xb   :  { %vm329_vm3 = vcmp.lt.s32.totalorder %v2286_v29, 112  ;;  %v2297_v34 = vperm.slane %v2288_v30, 7  ;;  %vm304_vm4 = vcmp.lt.s32.totalorder %v2286_v29, 113  ;;  %v2308_v39 = vperm.slane %v2288_v30, 6  ;;  %v2332_v53 = vld [vmem:[#allocation3 + $0x28] ss:$0 sm:$0xff] }
   0xc   :  { %vm279_vm5 = vcmp.lt.s32.totalorder %v2286_v29, 127  ;;  %v2321_v46 = vperm.slane %v2288_v30, 5  ;;  %v2337_v56 = vperm.slane %v2329_v52, 7  ;;  %v2346_v61 = vperm.slane %v2329_v52, 6  ;;  %v2355_v1 = vld [vmem:[#allocation3 + $0x10] sm:$0xff]  ;;  %v2360_v3 = vld [vmem:[#allocation3 + $0x18] sm:$0xff] }
   0xd   :  { %v2353_v0 = vperm.slane %v2329_v52, 5  ;;  %vm250_vm6 = vcmp.lt.s32.totalorder %v2286_v29, 1  ;;  %vm225_vm7 = vcmp.lt.s32.totalorder %v2286_v29, 15  ;;  %vm200_vm8 = vcmp.lt.s32.totalorder %v2286_v29, 16  ;;  %s2003_s10 = sshll.u32 %s3563_s8, 4  ;;  %s2004_s10 = int_to_ptr.hbm [resolvable:$true] %s2003_s10 }
   0xe   :  { %v60_v5 = vld.sshfl [vmem:[#allocation1] sm:$0xff pattern:$0x75316420]  ;;  %v61_v6 = vld.sshfl [vmem:[#allocation1 + $0x8] sm:$0xff pattern:$0x75316420] }
   0xf   :  { %2013 = vmatpush.msk.msra.mxu0 %vm68_vm0, %v60_v5  ;;  %2015 = vmatpush.msk.msra.mxu1 %vm68_vm0, %v61_v6  ;;  %v62_v7 = vld.sshfl [vmem:[#allocation1 + $0x10] sm:$0xff pattern:$0x75316420]  ;;  %v63_v8 = vld.sshfl [vmem:[#allocation1 + $0x18] sm:$0xff pattern:$0x75316420] }
  0x10   :  { %2017 = vmatpush.msk.msra.mxu2 %vm68_vm0, %v62_v7  ;;  %2019 = vmatpush.msk.msra.mxu3 %vm68_vm0, %v63_v8  ;;  %v2365_v5 = vperm.slane %v2288_v30, 3  ;;  %v2367_v6 = vld [vmem:[#allocation3 + $0x30] ss:$0 sm:$0xff]  ;;  %v2369_v7 = vld [vmem:[#allocation3 + $0x38] ss:$0 sm:$0xff]  ;;  %v2372_v8 = vperm.slane %v2355_v1, 7 }
  0x11   :  { %2014 = vmatmul.msk.f32.vlgmr.msra.gmra.mxu0 %vm64_vm1, %v46_v4  ;;  %2016 = vmatmul.msk.f32.vlgmr.msra.gmra.mxu1 %vm64_vm1, %v46_v4  ;;  %3580 = vst [vmem:[#allocation14_spill] sm:$0xff] %v2367_v6  ;;  %vm175_vm9 = vcmp.lt.s32.totalorder %v2286_v29, 17 }
  0x12   :  { %2018 = vmatmul.msk.f32.vlgmr.msra.gmra.mxu2 %vm64_vm1, %v46_v4  ;;  %2020 = vmatmul.msk.f32.vlgmr.msra.gmra.mxu3 %vm64_vm1, %v46_v4  ;;  %3581 = vst [vmem:[#allocation15_spill] sm:$0xff] %v2369_v7 }
  0x7a   :  { %v53_v9 = vpop.permute.xlu0 %52 }
  0x8e   :  { %v94_v10 = vpop.f32.mrf.mxu0  ;;  %v114_v12 = vpop.f32.mrf.mxu1 }
  0x8f   :  { %v2192_v11 = vadd.f32 %v94_v10, %v53_v9  ;;  %v2200_v13 = vadd.f32 %v114_v12, %v53_v9 }
  0x91   :  { %3575 = vst [vmem:[#allocation9_spill] sm:$0xff] %v2192_v11  ;;  %296 = vrot.lane.b32.xlu1 %v2192_v11, %s2123_s0  ;;  %321 = vrot.lane.b32.xlu2 %v2192_v11, %s2124_s2 }
  0x92   :  { %346 = vrot.lane.b32.xlu0 %v2192_v11, %s2125_s3  ;;  %3576 = vst [vmem:[#allocation10_spill] sm:$0xff] %v2200_v13 }
  0x95   :  { %v154_v14 = vpop.f32.mrf.mxu3  ;;  %v134_v16 = vpop.f32.mrf.mxu2 }
  0x96   :  { %v2214_v15 = vadd.f32 %v154_v14, %v53_v9  ;;  %v2222_v17 = vadd.f32 %v134_v16, %v53_v9  ;;  %v2376_v14 = vperm.slane %v2329_v52, 3 }
  0x98   :  { %3577 = vst [vmem:[#allocation11_spill] sm:$0xff] %v2214_v15 }
  0x99   :  { %271 = vrot.lane.b32.xlu1 %v2192_v11, %s2126_s19  ;;  %323 = vrot.lane.b32.xlu2 %v2200_v13, %s2124_s2  ;;  %3578 = vst [vmem:[#allocation12_spill] sm:$0xff] %v2222_v17 }
  0x9a   :  { %244 = vrot.lane.b32.xlu0 %v2200_v13, %s2127_s20 }
  0xa1   :  { %348 = vrot.lane.b32.xlu1 %v2200_v13, %s2125_s3  ;;  %194 = vrot.lane.b32.xlu2 %v2200_v13, %s2128_s21 }
  0xa2   :  { %298 = vrot.lane.b32.xlu0 %v2200_v13, %s2123_s0 }
  0xa9   :  { %219 = vrot.lane.b32.xlu1 %v2200_v13, %s2129_s22  ;;  %167 = vrot.lane.b32.xlu2 %v2200_v13, %s2130_s23 }
  0xaa   :  { %327 = vrot.lane.b32.xlu0 %v2214_v15, %s2124_s2 }
  0xb1   :  { %273 = vrot.lane.b32.xlu1 %v2200_v13, %s2126_s19  ;;  %325 = vrot.lane.b32.xlu2 %v2222_v17, %s2124_s2 }
  0xb2   :  { %302 = vrot.lane.b32.xlu0 %v2214_v15, %s2123_s0 }
  0xb9   :  { %350 = vrot.lane.b32.xlu1 %v2222_v17, %s2125_s3  ;;  %300 = vrot.lane.b32.xlu2 %v2222_v17, %s2123_s0 }
  0xba   :  { %277 = vrot.lane.b32.xlu0 %v2214_v15, %s2126_s19 }
  0xc1   :  { %352 = vrot.lane.b32.xlu1 %v2214_v15, %s2125_s3  ;;  %275 = vrot.lane.b32.xlu2 %v2222_v17, %s2126_s19 }
  0xc2   :  { %223 = vrot.lane.b32.xlu0 %v2214_v15, %s2129_s22 }
  0xc9   :  { %246 = vrot.lane.b32.xlu1 %v2222_v17, %s2127_s20  ;;  %248 = vrot.lane.b32.xlu2 %v2214_v15, %s2127_s20 }
  0xca   :  { %196 = vrot.lane.b32.xlu0 %v2222_v17, %s2128_s21 }
  0xd1   :  { %198 = vrot.lane.b32.xlu1 %v2214_v15, %s2128_s21  ;;  %221 = vrot.lane.b32.xlu2 %v2222_v17, %s2129_s22 }
  0xd2   :  { %169 = vrot.lane.b32.xlu0 %v2222_v17, %s2130_s23 }
  0xd9   :  { %171 = vrot.lane.b32.xlu1 %v2214_v15, %s2130_s23  ;;  %242 = vrot.lane.b32.xlu2 %v2192_v11, %s2127_s20 }
  0xda   :  { %217 = vrot.lane.b32.xlu0 %v2192_v11, %s2129_s22 }
  0xe1   :  { %192 = vrot.lane.b32.xlu1 %v2192_v11, %s2128_s21  ;;  %165 = vrot.lane.b32.xlu2 %v2192_v11, %s2130_s23 }
  0xe2   :  { %411 = vperm.xlu0 %2058, %v2263_v18  }
  0xeb   :  { %v2270_v19 = vpop.permute.xlu2 %321 }
  0xf3   :  { %v324_v20 = vpop.permute.xlu2 %323 }
  0xf4   :  { %v332_v37 = vsel %vm329_vm3, %v2270_v19, %v324_v20 }
  0xf5   :  { %v338_v41 = vmul.f32 %v2297_v34, %v332_v37 }
  0xfb   :  { %v2272_v21 = vpop.permute.xlu2 %194 }
 0x103   :  { %v2274_v22 = vpop.permute.xlu1 %296  ;;  %v2276_v23 = vpop.permute.xlu2 %167 }
 0x104   :  { %v2278_v24 = vpop.permute.xlu0 %346 }
 0x10b   :  { %v2280_v26 = vpop.permute.xlu1 %271  ;;  %v2282_v27 = vpop.permute.xlu2 %325 }
 0x10c   :  { %v2284_v28 = vpop.permute.xlu0 %244  ;;  %v331_v59 = vsel %vm329_vm3, %v324_v20, %v2282_v27  ;;  %v2382_v20 = vperm.slane %v2360_v3, 7 }
 0x10d   :  { %v339_v63 = vmul.f32 %v2337_v56, %v331_v59 }
 0x10e   :  { %3582 = vst [vmem:[#allocation16_spill] sm:$0xff] %v2382_v20 }
 0x113   :  { %v349_v32 = vpop.permute.xlu1 %348  ;;  %v2294_v33 = vpop.permute.xlu2 %300 }
 0x114   :  { %v299_v35 = vpop.permute.xlu0 %298  ;;  %v357_v36 = vsel %vm354_vm2, %v2278_v24, %v349_v32 }
 0x115   :  { %v363_v38 = vmul.f32 %v2291_v31, %v357_v36  ;;  %v307_v40 = vsel %vm304_vm4, %v2274_v22, %v299_v35  ;;  %v306_v62 = vsel %vm304_vm4, %v299_v35, %v2294_v33 }
 0x116   :  { %v313_v42 = vmul.f32 %v2308_v39, %v307_v40  ;;  %v314_v4 = vmul.f32 %v2346_v61, %v306_v62 }
 0x117   :  { %425 = vmatpush.msrb.mxu0 %v363_v38 }
 0x119   :  { %426 = vmatpush.msrb.mxu0 %v338_v41 }
 0x11b   :  { %v2315_v43 = vpop.permute.xlu1 %219  ;;  %v2317_v44 = vpop.permute.xlu2 %275  ;;  %427 = vmatpush.msrb.mxu0 %v313_v42  ;;  %v2404_v42 = vperm.slane %v2355_v1, 6 }
 0x11c   :  { %v328_v45 = vpop.permute.xlu0 %327 }
 0x11d   :  { %v330_v16 = vsel %vm329_vm3, %v2282_v27, %v328_v45  ;;  %v333_v41 = vsel %vm329_vm3, %v328_v45, %v2270_v19 }
 0x11e   :  { %v340_v19 = vmul.f32 %v2372_v8, %v330_v16  ;;  %v341_v45 = vmul.f32 %v2382_v20, %v333_v41 }
 0x123   :  { %v274_v47 = vpop.permute.xlu1 %273  ;;  %v2323_v48 = vpop.permute.xlu2 %248 }
 0x124   :  { %v303_v49 = vpop.permute.xlu0 %302  ;;  %v282_v50 = vsel %vm279_vm5, %v2280_v26, %v274_v47  ;;  %v281_v2 = vsel %vm279_vm5, %v274_v47, %v2317_v44 }
 0x125   :  { %v288_v51 = vmul.f32 %v2321_v46, %v282_v50  ;;  %v289_v12 = vmul.f32 %v2353_v0, %v281_v2  ;;  %v305_v50 = vsel %vm304_vm4, %v2294_v33, %v303_v49  ;;  %v2437_v2 = vperm.slane %v2355_v1, 3 }
 0x127   :  { %428 = vmatpush.msrb.mxu0 %v288_v51  ;;  %v308_v51 = vsel %vm304_vm4, %v303_v49, %v2274_v22  ;;  %v315_v49 = vmul.f32 %v2404_v42, %v305_v50 }
 0x129   :  { %429 = vmatpush.msrb.mxu0 %v2192_v11 }
 0x12b   :  { %v351_v54 = vpop.permute.xlu1 %350  ;;  %v2334_v55 = vpop.permute.xlu2 %221 }
 0x12c   :  { %v278_v57 = vpop.permute.xlu0 %277  ;;  %v356_v58 = vsel %vm354_vm2, %v349_v32, %v351_v54 }
 0x12d   :  { %v364_v60 = vmul.f32 %v2332_v53, %v356_v58  ;;  %v2423_v58 = vperm.slane %v2360_v3, 5  ;;  %v280_v33 = vsel %vm279_vm5, %v2317_v44, %v278_v57  ;;  %v283_v22 = vsel %vm279_vm5, %v278_v57, %v2280_v26 }
 0x12e   :  { %v2440_v26 = vperm.slane %v2360_v3, 3 }
 0x12f   :  { %445 = vmatpush.msrb.mxu1 %v364_v60  ;;  %v291_v44 = vmul.f32 %v2423_v58, %v283_v22  ;;  %v2504_v22 = vperm.slane %v2329_v52, 2 }
 0x131   :  { %446 = vmatpush.msrb.mxu1 %v339_v63 }
 0x133   :  { %v353_v9 = vpop.permute.xlu1 %352  ;;  %v243_v10 = vpop.permute.xlu2 %242  ;;  %447 = vmatpush.msrb.mxu1 %v314_v4 }
 0x134   :  { %v2384_v25 = vpop.permute.xlu0 %223  ;;  %v254_v32 = vsel %vm250_vm6, %v2323_v48, %v243_v10  ;;  %v355_v35 = vsel %vm354_vm2, %v351_v54, %v353_v9  ;;  %v358_v36 = vsel %vm354_vm2, %v353_v9, %v2278_v24  ;;  %v253_v27 = vsel %vm250_vm6, %v243_v10, %v2284_v28 }
 0x135   :  { %448 = vmatpush.msrb.mxu1 %v289_v12  ;;  %v259_v37 = vmul.f32 %v2365_v5, %v254_v32  ;;  %v365_v38 = vmul.f32 %v2367_v6, %v355_v35  ;;  %v366_v40 = vmul.f32 %v2369_v7, %v358_v36  ;;  %v2407_v24 = vperm.slane %v2360_v3, 6 }
 0x136   :  { %v260_v47 = vmul.f32 %v2376_v14, %v253_v27  ;;  %v2420_v54 = vperm.slane %v2355_v1, 5  ;;  %v2449_v9 = vperm.slane %v2355_v1, 2  ;;  %v2452_v10 = vperm.slane %v2360_v3, 2 }
 0x137   :  { %430 = vmatpush.msrb.mxu0 %v259_v37  ;;  %449 = vmatpush.msrb.mxu1 %v2200_v13  ;;  %v316_v59 = vmul.f32 %v2407_v24, %v308_v51  ;;  %v227_v12 = vsel %vm225_vm7, %v2315_v43, %v2334_v55  ;;  %v2468_v32 = vperm.slane %v2355_v1, 1  ;;  %v2474_v36 = vperm.slane %v2360_v3, 1 }
 0x138   :  { %465 = vmatpush.msrb.mxu2 %v365_v38  ;;  %485 = vmatpush.msrb.mxu3 %v366_v40  ;;  %v290_v63 = vmul.f32 %v2420_v54, %v280_v33  ;;  %v2479_v37 = vperm.slane %v2355_v1, 0  ;;  %v2501_v33 = vperm.slane %v2288_v30, 2 }
 0x139   :  { %450 = vmatpush.msrb.mxu1 %v260_v47 }
 0x13a   :  { %466 = vmatpush.msrb.mxu2 %v340_v19  ;;  %486 = vmatpush.msrb.mxu3 %v341_v45  ;;  %v2493_v19 = vld [vmem:[%s3559_s4] sm:$0xff]  ;;  %v2498_v45 = vperm.slane %v2360_v3, 0 }
 0x13b   :  { %v247_v60 = vpop.permute.xlu1 %246 }
 0x13c   :  { %467 = vmatpush.msrb.mxu2 %v315_v49  ;;  %487 = vmatpush.msrb.mxu3 %v316_v59  ;;  %v197_v62 = vpop.permute.xlu0 %196  ;;  %v252_v57 = vsel %vm250_vm6, %v2284_v28, %v247_v60  ;;  %v251_v4 = vsel %vm250_vm6, %v247_v60, %v2323_v48  ;;  %v226_v28 = vsel %vm225_vm7, %v2334_v55, %v2384_v25 }
 0x13d   :  { %v261_v48 = vmul.f32 %v2437_v2, %v252_v57  ;;  %v262_v16 = vmul.f32 %v2440_v26, %v251_v4  ;;  %v202_v35 = vsel %vm200_vm8, %v2272_v21, %v197_v62  ;;  %v236_v55 = vmul.f32 %v2449_v9, %v227_v12  ;;  %v166_v4 = vpop.permute.xlu2 %165 }
 0x13e   :  { %468 = vmatpush.msrb.mxu2 %v290_v63  ;;  %488 = vmatpush.msrb.mxu3 %v291_v44  ;;  %v237_v27 = vmul.f32 %v2452_v10, %v226_v28  ;;  %v211_v41 = vmul.f32 %v2468_v32, %v202_v35  ;;  %v2520_v12 = vperm.slane %v2288_v30, 1  ;;  %v2526_v28 = vperm.slane %v2288_v30, 0 }
 0x140   :  { %469 = vmatpush.msrb.mxu2 %v2222_v17  ;;  %489 = vmatpush.msrb.mxu3 %v2214_v15 }
 0x142   :  { %470 = vmatpush.msrb.mxu2 %v261_v48  ;;  %490 = vmatpush.msrb.mxu3 %v262_v16  ;;  %v2529_v48 = vperm.slane %v2329_v52, 0 }
 0x143   :  { %v199_v38 = vpop.permute.xlu1 %198 }
 0x144   :  { %471 = vmatpush.msrb.mxu2 %v236_v55  ;;  %491 = vmatpush.msrb.mxu3 %v237_v27  ;;  %v170_v40 = vpop.permute.xlu0 %169  ;;  %v201_v47 = vsel %vm200_vm8, %v197_v62, %v199_v38  ;;  %v178_v27 = vsel %vm175_vm9, %v166_v4, %v2276_v23 }
 0x145   :  { %v177_v50 = vsel %vm175_vm9, %v2276_v23, %v170_v40  ;;  %v212_v51 = vmul.f32 %v2474_v36, %v201_v47 }
 0x146   :  { %472 = vmatpush.msrb.mxu2 %v211_v41  ;;  %v186_v1 = vmul.f32 %v2479_v37, %v177_v50 }
 0x147   :  { %492 = vmatpush.msrb.mxu3 %v212_v51 }
 0x148   :  { %473 = vmatpush.msrb.mxu2 %v186_v1 }
 0x149   :  { %2023 = vmatmul.msk.f32.vlgmr.msrb.gmra.mxu2 %vm414_vm10, %v2493_v19 }
 0x14b   :  { %v172_v49 = vpop.permute.xlu1 %171 }
 0x14c   :  { %v218_v59 = vpop.permute.xlu0 %217  ;;  %v176_v60 = vsel %vm175_vm9, %v170_v40, %v172_v49  ;;  %v179_v55 = vsel %vm175_vm9, %v172_v49, %v166_v4 }
 0x14d   :  { %v229_v62 = vsel %vm225_vm7, %v2384_v25, %v218_v59  ;;  %v228_v3 = vsel %vm225_vm7, %v218_v59, %v2315_v43  ;;  %v187_v63 = vmul.f32 %v2498_v45, %v176_v60  ;;  %v2523_v25 = vperm.slane %v2329_v52, 1 }
 0x14e   :  { %v234_v44 = vmul.f32 %v2501_v33, %v229_v62  ;;  %v235_v57 = vmul.f32 %v2504_v22, %v228_v3  ;;  %v184_v52 = vmul.f32 %v2526_v28, %v179_v55 }
 0x14f   :  { %493 = vmatpush.msrb.mxu3 %v187_v63 }
 0x150   :  { %431 = vmatpush.msrb.mxu0 %v234_v44  ;;  %451 = vmatpush.msrb.mxu1 %v235_v57 }
 0x151   :  { %2024 = vmatmul.msk.f32.vlgmr.msrb.gmra.mxu3 %vm414_vm10, %v2493_v19 }
 0x153   :  { %v193_v43 = vpop.permute.xlu1 %192 }
 0x154   :  { %v204_v16 = vsel %vm200_vm8, %v199_v38, %v193_v43  ;;  %v203_v35 = vsel %vm200_vm8, %v193_v43, %v2272_v21  ;;  %v185_v38 = vmul.f32 %v2529_v48, %v178_v27  ;;  %v412_v21 = vpop.permute.xlu0 %411 }
 0x155   :  { %v209_v30 = vmul.f32 %v2520_v12, %v204_v16  ;;  %v210_v40 = vmul.f32 %v2523_v25, %v203_v35 }
 0x157   :  { %432 = vmatpush.msrb.mxu0 %v209_v30  ;;  %452 = vmatpush.msrb.mxu1 %v210_v40 }
 0x159   :  { %433 = vmatpush.msrb.mxu0 %v184_v52  ;;  %453 = vmatpush.msrb.mxu1 %v185_v38 }
 0x15a   :  { %2021 = vmatmul.msk.f32.vlgmr.msrb.gmra.mxu0 %vm414_vm10, %v2493_v19  ;;  %2022 = vmatmul.msk.f32.vlgmr.msrb.gmra.mxu1 %vm414_vm10, %v2493_v19 }
 0x1cc   :  { %v475_v63 = vpop.f32.mrf.mxu2 }
 0x1cd   :  { %v476_v44 = vadd.f32 %v475_v63, %v412_v21 }
 0x1cf   :  { %v500_v4 = vmax.f32 %v476_v44, 0.0 }
 0x1d1   :  { %v2577_v43 = vadd.f32 %v500_v4, %v2222_v17 }
 0x1d4   :  { %v495_v60 = vpop.f32.mrf.mxu3 }
 0x1d5   :  { %v496_v62 = vadd.f32 %v495_v60, %v412_v21 }
 0x1d7   :  { %v435_v23 = vpop.f32.mrf.mxu0  ;;  %v455_v41 = vpop.f32.mrf.mxu1  ;;  %v501_v3 = vmax.f32 %v496_v62, 0.0 }
 0x1d8   :  { %v436_v47 = vadd.f32 %v435_v23, %v412_v21  ;;  %v456_v50 = vadd.f32 %v455_v41, %v412_v21 }
 0x1d9   :  { %v2568_v57 = vadd.f32 %v501_v3, %v2214_v15 }
 0x1da   :  { %v498_v51 = vmax.f32 %v436_v47, 0.0  ;;  %v499_v1 = vmax.f32 %v456_v50, 0.0 }
 0x1dc   :  { %v2550_v49 = vadd.f32 %v498_v51, %v2192_v11  ;;  %v2553_v59 = vadd.f32 %v499_v1, %v2200_v13 }
 0x1de   :  { %568 = vrot.lane.b32.xlu0 %v2553_v59, %s2127_s20  ;;  %632 = vrot.lane.b32.xlu2 %v2553_v59, %s2124_s2 }
 0x1df   :  { %650 = vrot.lane.b32.xlu1 %v2550_v49, %s2125_s3 }
 0x1e6   :  { %612 = vrot.lane.b32.xlu0 %v2553_v59, %s2123_s0  ;;  %528 = vrot.lane.b32.xlu2 %v2553_v59, %s2128_s21 }
 0x1e7   :  { %630 = vrot.lane.b32.xlu1 %v2550_v49, %s2124_s2 }
 0x1ee   :  { %656 = vrot.lane.b32.xlu0 %v2568_v57, %s2125_s3  ;;  %508 = vrot.lane.b32.xlu2 %v2553_v59, %s2130_s23 }
 0x1ef   :  { %610 = vrot.lane.b32.xlu1 %v2550_v49, %s2123_s0 }
 0x1f6   :  { %636 = vrot.lane.b32.xlu0 %v2568_v57, %s2124_s2  ;;  %654 = vrot.lane.b32.xlu2 %v2577_v43, %s2125_s3 }
 0x1f7   :  { %590 = vrot.lane.b32.xlu1 %v2550_v49, %s2126_s19 }
 0x1fe   :  { %616 = vrot.lane.b32.xlu0 %v2568_v57, %s2123_s0  ;;  %634 = vrot.lane.b32.xlu2 %v2577_v43, %s2124_s2 }
 0x1ff   :  { %652 = vrot.lane.b32.xlu1 %v2553_v59, %s2125_s3 }
 0x206   :  { %596 = vrot.lane.b32.xlu0 %v2568_v57, %s2126_s19  ;;  %614 = vrot.lane.b32.xlu2 %v2577_v43, %s2123_s0 }
 0x207   :  { %548 = vrot.lane.b32.xlu1 %v2553_v59, %s2129_s22 }
 0x20e   :  { %552 = vrot.lane.b32.xlu0 %v2568_v57, %s2129_s22  ;;  %594 = vrot.lane.b32.xlu2 %v2577_v43, %s2126_s19 }
 0x20f   :  { %592 = vrot.lane.b32.xlu1 %v2553_v59, %s2126_s19 }
 0x216   :  { %530 = vrot.lane.b32.xlu0 %v2577_v43, %s2128_s21  ;;  %572 = vrot.lane.b32.xlu2 %v2568_v57, %s2127_s20 }
 0x217   :  { %570 = vrot.lane.b32.xlu1 %v2577_v43, %s2127_s20 }
 0x21e   :  { %510 = vrot.lane.b32.xlu0 %v2577_v43, %s2130_s23  ;;  %550 = vrot.lane.b32.xlu2 %v2577_v43, %s2129_s22 }
 0x21f   :  { %532 = vrot.lane.b32.xlu1 %v2568_v57, %s2128_s21 }
 0x226   :  { %546 = vrot.lane.b32.xlu0 %v2550_v49, %s2129_s22  ;;  %566 = vrot.lane.b32.xlu2 %v2550_v49, %s2127_s20 }
 0x227   :  { %512 = vrot.lane.b32.xlu1 %v2568_v57, %s2130_s23 }
 0x22e   :  { %710 = vperm.xlu0 %2058, %v2263_v18   ;;  %506 = vrot.lane.b32.xlu2 %v2550_v49, %s2130_s23 }
 0x22f   :  { %526 = vrot.lane.b32.xlu1 %v2550_v49, %s2128_s21 }
 0x238   :  { %v633_v16 = vpop.permute.xlu2 %632 }
 0x240   :  { %v2626_v35 = vpop.permute.xlu2 %528 }
 0x248   :  { %v2628_v55 = vpop.permute.xlu2 %508 }
 0x250   :  { %v2630_v27 = vpop.permute.xlu0 %568  ;;  %v655_v30 = vpop.permute.xlu2 %654 }
 0x251   :  { %v651_v40 = vpop.permute.xlu1 %650 }
 0x258   :  { %v613_v52 = vpop.permute.xlu0 %612  ;;  %v635_v38 = vpop.permute.xlu2 %634 }
 0x259   :  { %v631_v21 = vpop.permute.xlu1 %630 }
 0x260   :  { %v657_v23 = vpop.permute.xlu0 %656  ;;  %v615_v41 = vpop.permute.xlu2 %614 }
 0x261   :  { %v658_v47 = vsel %vm354_vm2, %v655_v30, %v657_v23  ;;  %v661_v50 = vsel %vm354_vm2, %v657_v23, %v651_v40  ;;  %v611_v51 = vpop.permute.xlu1 %610 }
 0x262   :  { %v664_v1 = vmul.f32 %v2367_v6, %v658_v47  ;;  %v665_v60 = vmul.f32 %v2369_v7, %v661_v50  ;;  %v639_v50 = vsel %vm329_vm3, %v633_v16, %v635_v38 }
 0x264   :  { %763 = vmatpush.msra.mxu2 %v664_v1  ;;  %783 = vmatpush.msra.mxu3 %v665_v60  ;;  %v640_v1 = vsel %vm329_vm3, %v631_v21, %v633_v16 }
 0x268   :  { %v637_v62 = vpop.permute.xlu0 %636  ;;  %v595_v3 = vpop.permute.xlu2 %594 }
 0x269   :  { %v638_v63 = vsel %vm329_vm3, %v635_v38, %v637_v62  ;;  %v641_v44 = vsel %vm329_vm3, %v637_v62, %v631_v21  ;;  %v591_v4 = vpop.permute.xlu1 %590  ;;  %v619_v21 = vsel %vm304_vm4, %v613_v52, %v615_v41 }
 0x26a   :  { %v644_v18 = vmul.f32 %v638_v63, %v2372_v8  ;;  %v645_v23 = vmul.f32 %v641_v44, %v2382_v20 }
 0x26c   :  { %764 = vmatpush.msra.mxu2 %v644_v18  ;;  %784 = vmatpush.msra.mxu3 %v645_v23 }
 0x270   :  { %v617_v47 = vpop.permute.xlu0 %616  ;;  %v573_v6 = vpop.permute.xlu2 %572 }
 0x271   :  { %v618_v60 = vsel %vm304_vm4, %v615_v41, %v617_v47  ;;  %v621_v62 = vsel %vm304_vm4, %v617_v47, %v611_v51  ;;  %v653_v7 = vpop.permute.xlu1 %652  ;;  %v620_v47 = vsel %vm304_vm4, %v611_v51, %v613_v52 }
 0x272   :  { %v659_v63 = vsel %vm354_vm2, %v653_v7, %v655_v30  ;;  %v660_v18 = vsel %vm354_vm2, %v651_v40, %v653_v7  ;;  %v624_v44 = vmul.f32 %v618_v60, %v2404_v42  ;;  %v625_v38 = vmul.f32 %v621_v62, %v2407_v24 }
 0x273   :  { %v662_v23 = vmul.f32 %v2291_v31, %v660_v18  ;;  %v663_v16 = vmul.f32 %v2332_v53, %v659_v63  ;;  %v642_v7 = vmul.f32 %v640_v1, %v2297_v34  ;;  %v643_v30 = vmul.f32 %v639_v50, %v2337_v56 }
 0x274   :  { %765 = vmatpush.msra.mxu2 %v624_v44  ;;  %785 = vmatpush.msra.mxu3 %v625_v38  ;;  %v622_v40 = vmul.f32 %v620_v47, %v2308_v39  ;;  %v623_v60 = vmul.f32 %v619_v21, %v2346_v61 }
 0x275   :  { %723 = vmatpush.msra.mxu0 %v662_v23  ;;  %743 = vmatpush.msra.mxu1 %v663_v16 }
 0x277   :  { %724 = vmatpush.msra.mxu0 %v642_v7  ;;  %744 = vmatpush.msra.mxu1 %v643_v30 }
 0x278   :  { %v597_v62 = vpop.permute.xlu0 %596  ;;  %v551_v63 = vpop.permute.xlu2 %550 }
 0x279   :  { %v598_v41 = vsel %vm279_vm5, %v595_v3, %v597_v62  ;;  %v601_v52 = vsel %vm279_vm5, %v597_v62, %v591_v4  ;;  %725 = vmatpush.msra.mxu0 %v622_v40  ;;  %745 = vmatpush.msra.mxu1 %v623_v60  ;;  %v549_v51 = vpop.permute.xlu1 %548 }
 0x27a   :  { %v604_v1 = vmul.f32 %v598_v41, %v2420_v54  ;;  %v605_v50 = vmul.f32 %v601_v52, %v2423_v58  ;;  %v555_v40 = vsel %vm225_vm7, %v549_v51, %v551_v63 }
 0x27c   :  { %766 = vmatpush.msra.mxu2 %v604_v1  ;;  %786 = vmatpush.msra.mxu3 %v605_v50 }
 0x27e   :  { %767 = vmatpush.msra.mxu2 %v2577_v43  ;;  %787 = vmatpush.msra.mxu3 %v2568_v57 }
 0x280   :  { %v553_v18 = vpop.permute.xlu0 %552  ;;  %v567_v44 = vpop.permute.xlu2 %566 }
 0x281   :  { %v593_v38 = vpop.permute.xlu1 %592  ;;  %v576_v47 = vsel %vm250_vm6, %v567_v44, %v2630_v27  ;;  %v577_v57 = vsel %vm250_vm6, %v573_v6, %v567_v44  ;;  %v554_v60 = vsel %vm225_vm7, %v551_v63, %v553_v18  ;;  %v560_v63 = vmul.f32 %v555_v40, %v2449_v9 }
 0x282   :  { %v599_v23 = vsel %vm279_vm5, %v593_v38, %v595_v3  ;;  %v600_v16 = vsel %vm279_vm5, %v591_v4, %v593_v38  ;;  %v579_v43 = vmul.f32 %v576_v47, %v2376_v14  ;;  %v578_v3 = vmul.f32 %v577_v57, %v2365_v5 }
 0x283   :  { %v603_v21 = vmul.f32 %v599_v23, %v2353_v0  ;;  %v602_v7 = vmul.f32 %v600_v16, %v2321_v46  ;;  %v561_v1 = vmul.f32 %v554_v60, %v2452_v10 }
 0x285   :  { %746 = vmatpush.msra.mxu1 %v603_v21  ;;  %726 = vmatpush.msra.mxu0 %v602_v7 }
 0x287   :  { %747 = vmatpush.msra.mxu1 %v2553_v59  ;;  %727 = vmatpush.msra.mxu0 %v2550_v49 }
 0x288   :  { %v531_v4 = vpop.permute.xlu0 %530 }
 0x289   :  { %748 = vmatpush.msra.mxu1 %v579_v43  ;;  %v571_v30 = vpop.permute.xlu1 %570  ;;  %728 = vmatpush.msra.mxu0 %v578_v3  ;;  %v535_v52 = vsel %vm200_vm8, %v2626_v35, %v531_v4 }
 0x28a   :  { %v574_v62 = vsel %vm250_vm6, %v571_v30, %v573_v6  ;;  %v575_v59 = vsel %vm250_vm6, %v2630_v27, %v571_v30  ;;  %v540_v6 = vmul.f32 %v535_v52, %v2468_v32 }
 0x28b   :  { %v580_v41 = vmul.f32 %v575_v59, %v2437_v2  ;;  %v581_v49 = vmul.f32 %v574_v62, %v2440_v26 }
 0x28d   :  { %768 = vmatpush.msra.mxu2 %v580_v41  ;;  %788 = vmatpush.msra.mxu3 %v581_v49 }
 0x28f   :  { %769 = vmatpush.msra.mxu2 %v560_v63  ;;  %789 = vmatpush.msra.mxu3 %v561_v1 }
 0x290   :  { %v511_v50 = vpop.permute.xlu0 %510 }
 0x291   :  { %v515_v27 = vsel %vm175_vm9, %v2628_v55, %v511_v50  ;;  %770 = vmatpush.msra.mxu2 %v540_v6  ;;  %v533_v44 = vpop.permute.xlu1 %532 }
 0x292   :  { %v520_v38 = vmul.f32 %v515_v27, %v2479_v37  ;;  %v534_v23 = vsel %vm200_vm8, %v531_v4, %v533_v44 }
 0x293   :  { %v541_v16 = vmul.f32 %v534_v23, %v2474_v36 }
 0x294   :  { %771 = vmatpush.msra.mxu2 %v520_v38 }
 0x295   :  { %790 = vmatpush.msra.mxu3 %v541_v16  ;;  %2027 = vmatmul.msk.f32.vlgmr.msra.gmra.mxu2 %vm414_vm10, %v2493_v19 }
 0x298   :  { %v547_v21 = vpop.permute.xlu0 %546 }
 0x299   :  { %v556_v47 = vsel %vm225_vm7, %v547_v21, %v549_v51  ;;  %v557_v7 = vsel %vm225_vm7, %v553_v18, %v547_v21  ;;  %v513_v57 = vpop.permute.xlu1 %512  ;;  %v507_v51 = vpop.permute.xlu2 %506 }
 0x29a   :  { %v558_v43 = vmul.f32 %v557_v7, %v2501_v33  ;;  %v559_v3 = vmul.f32 %v556_v47, %v2504_v22  ;;  %v514_v4 = vsel %vm175_vm9, %v511_v50, %v513_v57  ;;  %v516_v18 = vsel %vm175_vm9, %v507_v51, %v2628_v55 }
 0x29b   :  { %v521_v30 = vmul.f32 %v514_v4, %v2498_v45  ;;  %v517_v60 = vsel %vm175_vm9, %v513_v57, %v507_v51  ;;  %v519_v52 = vmul.f32 %v516_v18, %v2529_v48 }
 0x29c   :  { %729 = vmatpush.msra.mxu0 %v558_v43  ;;  %749 = vmatpush.msra.mxu1 %v559_v3  ;;  %v518_v1 = vmul.f32 %v517_v60, %v2526_v28 }
 0x29d   :  { %791 = vmatpush.msra.mxu3 %v521_v30  ;;  %v3583_v30 = vld [vmem:[#allocation13_spill] sm:$0xff] }
 0x29e   :  { %2028 = vmatmul.msk.f32.vlgmr.msra.gmra.mxu3 %vm414_vm10, %v2493_v19 }
 0x2a1   :  { %v527_v40 = vpop.permute.xlu1 %526 }
 0x2a2   :  { %v536_v62 = vsel %vm200_vm8, %v527_v40, %v2626_v35  ;;  %v537_v59 = vsel %vm200_vm8, %v533_v44, %v527_v40  ;;  %v711_v35 = vpop.permute.xlu0 %710 }
 0x2a3   :  { %v538_v41 = vmul.f32 %v537_v59, %v2520_v12  ;;  %v539_v49 = vmul.f32 %v536_v62, %v2523_v25 }
 0x2a5   :  { %730 = vmatpush.msra.mxu0 %v538_v41  ;;  %750 = vmatpush.msra.mxu1 %v539_v49 }
 0x2a7   :  { %731 = vmatpush.msra.mxu0 %v518_v1  ;;  %751 = vmatpush.msra.mxu1 %v519_v52 }
 0x2a8   :  { %2025 = vmatmul.msk.f32.vlgmr.msra.gmra.mxu0 %vm414_vm10, %v2493_v19  ;;  %2026 = vmatmul.msk.f32.vlgmr.msra.gmra.mxu1 %vm414_vm10, %v2493_v19 }
 0x318   :  { %v773_v7 = vpop.f32.mrf.mxu2 }
 0x319   :  { %v774_v43 = vadd.f32 %v773_v7, %v711_v35 }
 0x31b   :  { %v798_v3 = vmax.f32 %v774_v43, 0.0 }
 0x31d   :  { %v2774_v4 = vadd.f32 %v798_v3, %v2222_v17 }
 0x321   :  { %v793_v16 = vpop.f32.mrf.mxu3 }
 0x322   :  { %v794_v21 = vadd.f32 %v793_v16, %v711_v35 }
 0x324   :  { %v799_v47 = vmax.f32 %v794_v21, 0.0 }
 0x325   :  { %v733_v55 = vpop.f32.mrf.mxu0  ;;  %v753_v63 = vpop.f32.mrf.mxu1 }
 0x326   :  { %v734_v6 = vadd.f32 %v733_v55, %v711_v35  ;;  %v754_v50 = vadd.f32 %v753_v63, %v711_v35  ;;  %v2765_v57 = vadd.f32 %v799_v47, %v2214_v15 }
 0x328   :  { %v796_v27 = vmax.f32 %v734_v6, 0.0  ;;  %v797_v44 = vmax.f32 %v754_v50, 0.0  ;;  %v3584_v50 = vld [vmem:[#allocation14_spill] sm:$0xff] }
 0x32a   :  { %v2747_v38 = vadd.f32 %v796_v27, %v2192_v11  ;;  %v2750_v23 = vadd.f32 %v797_v44, %v2200_v13  ;;  %v3585_v44 = vld [vmem:[#allocation15_spill] sm:$0xff] }
 0x32c   :  { %948 = vrot.lane.b32.xlu1 %v2747_v38, %s2125_s3  ;;  %866 = vrot.lane.b32.xlu0 %v2750_v23, %s2127_s20 }
 0x32d   :  { %930 = vrot.lane.b32.xlu2 %v2750_v23, %s2124_s2 }
 0x334   :  { %928 = vrot.lane.b32.xlu1 %v2747_v38, %s2124_s2  ;;  %910 = vrot.lane.b32.xlu0 %v2750_v23, %s2123_s0 }
 0x335   :  { %826 = vrot.lane.b32.xlu2 %v2750_v23, %s2128_s21 }
 0x33c   :  { %908 = vrot.lane.b32.xlu1 %v2747_v38, %s2123_s0  ;;  %954 = vrot.lane.b32.xlu0 %v2765_v57, %s2125_s3 }
 0x33d   :  { %806 = vrot.lane.b32.xlu2 %v2750_v23, %s2130_s23 }
 0x344   :  { %888 = vrot.lane.b32.xlu1 %v2747_v38, %s2126_s19  ;;  %934 = vrot.lane.b32.xlu0 %v2765_v57, %s2124_s2 }
 0x345   :  { %952 = vrot.lane.b32.xlu2 %v2774_v4, %s2125_s3 }
 0x34c   :  { %914 = vrot.lane.b32.xlu0 %v2765_v57, %s2123_s0  ;;  %950 = vrot.lane.b32.xlu1 %v2750_v23, %s2125_s3 }
 0x34d   :  { %932 = vrot.lane.b32.xlu2 %v2774_v4, %s2124_s2 }
 0x354   :  { %894 = vrot.lane.b32.xlu0 %v2765_v57, %s2126_s19  ;;  %846 = vrot.lane.b32.xlu1 %v2750_v23, %s2129_s22 }
 0x355   :  { %912 = vrot.lane.b32.xlu2 %v2774_v4, %s2123_s0 }
 0x35c   :  { %850 = vrot.lane.b32.xlu0 %v2765_v57, %s2129_s22  ;;  %890 = vrot.lane.b32.xlu1 %v2750_v23, %s2126_s19 }
 0x35d   :  { %892 = vrot.lane.b32.xlu2 %v2774_v4, %s2126_s19 }
 0x364   :  { %828 = vrot.lane.b32.xlu0 %v2774_v4, %s2128_s21  ;;  %868 = vrot.lane.b32.xlu1 %v2774_v4, %s2127_s20 }
 0x365   :  { %870 = vrot.lane.b32.xlu2 %v2765_v57, %s2127_s20 }
 0x36c   :  { %808 = vrot.lane.b32.xlu0 %v2774_v4, %s2130_s23  ;;  %830 = vrot.lane.b32.xlu1 %v2765_v57, %s2128_s21 }
 0x36d   :  { %848 = vrot.lane.b32.xlu2 %v2774_v4, %s2129_s22 }
 0x374   :  { %844 = vrot.lane.b32.xlu0 %v2747_v38, %s2129_s22  ;;  %810 = vrot.lane.b32.xlu1 %v2765_v57, %s2130_s23 }
 0x375   :  { %864 = vrot.lane.b32.xlu2 %v2747_v38, %s2127_s20 }
 0x37c   :  { %1008 = vperm.xlu0 %2058, %v3583_v30   ;;  %824 = vrot.lane.b32.xlu1 %v2747_v38, %s2128_s21 }
 0x37d   :  { %804 = vrot.lane.b32.xlu2 %v2747_v38, %s2130_s23 }
 0x387   :  { %v931_v51 = vpop.permute.xlu2 %930 }
 0x38f   :  { %v2823_v40 = vpop.permute.xlu2 %826 }
 0x397   :  { %v2825_v18 = vpop.permute.xlu2 %806 }
 0x39e   :  { %v949_v60 = vpop.permute.xlu1 %948  ;;  %v2827_v62 = vpop.permute.xlu0 %866 }
 0x39f   :  { %v953_v59 = vpop.permute.xlu2 %952 }
 0x3a6   :  { %v929_v41 = vpop.permute.xlu1 %928  ;;  %v911_v49 = vpop.permute.xlu0 %910 }
 0x3a7   :  { %v933_v52 = vpop.permute.xlu2 %932 }
 0x3ae   :  { %v909_v1 = vpop.permute.xlu1 %908  ;;  %v955_v35 = vpop.permute.xlu0 %954 }
 0x3af   :  { %v956_v55 = vsel %vm354_vm2, %v953_v59, %v955_v35  ;;  %v959_v63 = vsel %vm354_vm2, %v955_v35, %v949_v60  ;;  %v913_v6 = vpop.permute.xlu2 %912 }
 0x3b0   :  { %v962_v27 = vmul.f32 %v3584_v50, %v956_v55  ;;  %v963_v16 = vmul.f32 %v3585_v44, %v959_v63  ;;  %v938_v55 = vsel %vm329_vm3, %v929_v41, %v931_v51  ;;  %v937_v63 = vsel %vm329_vm3, %v931_v51, %v933_v52 }
 0x3b1   :  { %v940_v13 = vmul.f32 %v938_v55, %v2297_v34 }
 0x3b2   :  { %1061 = vmatpush.msrb.mxu2 %v962_v27  ;;  %1081 = vmatpush.msrb.mxu3 %v963_v16 }
 0x3b6   :  { %v889_v21 = vpop.permute.xlu1 %888  ;;  %v935_v47 = vpop.permute.xlu0 %934 }
 0x3b7   :  { %v936_v7 = vsel %vm329_vm3, %v933_v52, %v935_v47  ;;  %v939_v43 = vsel %vm329_vm3, %v935_v47, %v929_v41  ;;  %v893_v3 = vpop.permute.xlu2 %892 }
 0x3b8   :  { %v942_v30 = vmul.f32 %v936_v7, %v2372_v8  ;;  %v943_v35 = vmul.f32 %v939_v43, %v2382_v20 }
 0x3ba   :  { %1062 = vmatpush.msrb.mxu2 %v942_v30  ;;  %1082 = vmatpush.msrb.mxu3 %v943_v35  ;;  %v918_v35 = vsel %vm304_vm4, %v909_v1, %v911_v49 }
 0x3be   :  { %v915_v50 = vpop.permute.xlu0 %914  ;;  %v951_v27 = vpop.permute.xlu1 %950 }
 0x3bf   :  { %v916_v44 = vsel %vm304_vm4, %v913_v6, %v915_v50  ;;  %v919_v16 = vsel %vm304_vm4, %v915_v50, %v909_v1  ;;  %v871_v47 = vpop.permute.xlu2 %870  ;;  %v957_v7 = vsel %vm354_vm2, %v951_v27, %v953_v59  ;;  %v958_v43 = vsel %vm354_vm2, %v949_v60, %v951_v27 }
 0x3c0   :  { %v922_v41 = vmul.f32 %v916_v44, %v2404_v42  ;;  %v923_v30 = vmul.f32 %v919_v16, %v2407_v24  ;;  %v960_v51 = vmul.f32 %v2291_v31, %v958_v43  ;;  %v961_v52 = vmul.f32 %v2332_v53, %v957_v7 }
 0x3c1   :  { %v917_v50 = vsel %vm304_vm4, %v911_v49, %v913_v6  ;;  %v941_v59 = vmul.f32 %v937_v63, %v2337_v56  ;;  %v920_v60 = vmul.f32 %v918_v35, %v2308_v39 }
 0x3c2   :  { %1021 = vmatpush.msrb.mxu0 %v960_v51  ;;  %1041 = vmatpush.msrb.mxu1 %v961_v52  ;;  %v921_v31 = vmul.f32 %v917_v50, %v2346_v61 }
 0x3c3   :  { %1063 = vmatpush.msrb.mxu2 %v922_v41  ;;  %1083 = vmatpush.msrb.mxu3 %v923_v30 }
 0x3c4   :  { %1022 = vmatpush.msrb.mxu0 %v940_v13  ;;  %1042 = vmatpush.msrb.mxu1 %v941_v59 }
 0x3c6   :  { %v895_v53 = vpop.permute.xlu0 %894  ;;  %1023 = vmatpush.msrb.mxu0 %v920_v60  ;;  %1043 = vmatpush.msrb.mxu1 %v921_v31  ;;  %v847_v1 = vpop.permute.xlu1 %846 }
 0x3c7   :  { %v896_v49 = vsel %vm279_vm5, %v893_v3, %v895_v53  ;;  %v899_v6 = vsel %vm279_vm5, %v895_v53, %v889_v21  ;;  %v849_v55 = vpop.permute.xlu2 %848 }
 0x3c8   :  { %v902_v63 = vmul.f32 %v896_v49, %v2420_v54  ;;  %v903_v27 = vmul.f32 %v899_v6, %v2423_v58  ;;  %v853_v35 = vsel %vm225_vm7, %v847_v1, %v849_v55 }
 0x3c9   :  { %v858_v53 = vmul.f32 %v853_v35, %v2449_v9 }
 0x3ca   :  { %1064 = vmatpush.msrb.mxu2 %v902_v63  ;;  %1084 = vmatpush.msrb.mxu3 %v903_v27 }
 0x3cc   :  { %1065 = vmatpush.msrb.mxu2 %v2774_v4  ;;  %1085 = vmatpush.msrb.mxu3 %v2765_v57 }
 0x3ce   :  { %v851_v13 = vpop.permute.xlu0 %850  ;;  %v891_v44 = vpop.permute.xlu1 %890 }
 0x3cf   :  { %v865_v16 = vpop.permute.xlu2 %864  ;;  %v897_v7 = vsel %vm279_vm5, %v891_v44, %v893_v3  ;;  %v898_v43 = vsel %vm279_vm5, %v889_v21, %v891_v44  ;;  %v852_v50 = vsel %vm225_vm7, %v849_v55, %v851_v13 }
 0x3d0   :  { %v900_v41 = vmul.f32 %v898_v43, %v2321_v46  ;;  %v875_v30 = vsel %vm250_vm6, %v871_v47, %v865_v16  ;;  %v901_v51 = vmul.f32 %v897_v7, %v2353_v0  ;;  %v874_v57 = vsel %vm250_vm6, %v865_v16, %v2827_v62 }
 0x3d1   :  { %v876_v4 = vmul.f32 %v875_v30, %v2365_v5  ;;  %v877_v3 = vmul.f32 %v874_v57, %v2376_v14  ;;  %v859_v49 = vmul.f32 %v852_v50, %v2452_v10 }
 0x3d2   :  { %1024 = vmatpush.msrb.mxu0 %v900_v41  ;;  %1044 = vmatpush.msrb.mxu1 %v901_v51 }
 0x3d4   :  { %1025 = vmatpush.msrb.mxu0 %v2747_v38  ;;  %1045 = vmatpush.msrb.mxu1 %v2750_v23 }
 0x3d6   :  { %v829_v21 = vpop.permute.xlu0 %828  ;;  %1026 = vmatpush.msrb.mxu0 %v876_v4  ;;  %v869_v52 = vpop.permute.xlu1 %868  ;;  %1046 = vmatpush.msrb.mxu1 %v877_v3 }
 0x3d7   :  { %v872_v59 = vsel %vm250_vm6, %v869_v52, %v871_v47  ;;  %v873_v38 = vsel %vm250_vm6, %v2827_v62, %v869_v52  ;;  %v833_v31 = vsel %vm200_vm8, %v2823_v40, %v829_v21  ;;  %v805_v3 = vpop.permute.xlu2 %804 }
 0x3d8   :  { %v878_v60 = vmul.f32 %v873_v38, %v2437_v2  ;;  %v879_v23 = vmul.f32 %v872_v59, %v2440_v26  ;;  %v838_v47 = vmul.f32 %v833_v31, %v2468_v32 }
 0x3da   :  { %1066 = vmatpush.msrb.mxu2 %v878_v60  ;;  %1086 = vmatpush.msrb.mxu3 %v879_v23 }
 0x3dc   :  { %1067 = vmatpush.msrb.mxu2 %v858_v53  ;;  %1087 = vmatpush.msrb.mxu3 %v859_v49 }
 0x3de   :  { %v809_v6 = vpop.permute.xlu0 %808  ;;  %1068 = vmatpush.msrb.mxu2 %v838_v47  ;;  %v831_v62 = vpop.permute.xlu1 %830 }
 0x3df   :  { %v813_v55 = vsel %vm175_vm9, %v2825_v18, %v809_v6  ;;  %v832_v63 = vsel %vm200_vm8, %v829_v21, %v831_v62 }
 0x3e0   :  { %v818_v27 = vmul.f32 %v813_v55, %v2479_v37  ;;  %v839_v44 = vmul.f32 %v832_v63, %v2474_v36 }
 0x3e2   :  { %1069 = vmatpush.msrb.mxu2 %v818_v27  ;;  %1088 = vmatpush.msrb.mxu3 %v839_v44  ;;  %v3014_v44 = vld [vmem:[%s3562_s7] sm:$0xff] }
 0x3e3   :  { %2031 = vmatmul.msk.f32.vlgmr.msrb.gmra.mxu2 %vm414_vm10, %v2493_v19  ;;  %3586 = vst [vmem:[#allocation13_spill] sm:$0xff] %v3014_v44 }
 0x3e6   :  { %v845_v16 = vpop.permute.xlu0 %844  ;;  %v811_v7 = vpop.permute.xlu1 %810 }
 0x3e7   :  { %v854_v43 = vsel %vm225_vm7, %v845_v16, %v847_v1  ;;  %v855_v41 = vsel %vm225_vm7, %v851_v13, %v845_v16  ;;  %v812_v30 = vsel %vm175_vm9, %v809_v6, %v811_v7  ;;  %v814_v13 = vsel %vm175_vm9, %v805_v3, %v2825_v18 }
 0x3e8   :  { %v856_v51 = vmul.f32 %v855_v41, %v2501_v33  ;;  %v857_v57 = vmul.f32 %v854_v43, %v2504_v22  ;;  %v819_v4 = vmul.f32 %v812_v30, %v2498_v45  ;;  %v815_v21 = vsel %vm175_vm9, %v811_v7, %v805_v3 }
 0x3e9   :  { %v817_v38 = vmul.f32 %v814_v13, %v2529_v48  ;;  %v816_v60 = vmul.f32 %v815_v21, %v2526_v28 }
 0x3ea   :  { %1027 = vmatpush.msrb.mxu0 %v856_v51  ;;  %1047 = vmatpush.msrb.mxu1 %v857_v57 }
 0x3eb   :  { %1089 = vmatpush.msrb.mxu3 %v819_v4 }
 0x3ec   :  { %2032 = vmatmul.msk.f32.vlgmr.msrb.gmra.mxu3 %vm414_vm10, %v2493_v19 }
 0x3ee   :  { %v825_v1 = vpop.permute.xlu1 %824 }
 0x3ef   :  { %v834_v52 = vsel %vm200_vm8, %v825_v1, %v2823_v40  ;;  %v835_v35 = vsel %vm200_vm8, %v831_v62, %v825_v1  ;;  %v1009_v40 = vpop.permute.xlu0 %1008 }
 0x3f0   :  { %v836_v50 = vmul.f32 %v835_v35, %v2520_v12  ;;  %v837_v59 = vmul.f32 %v834_v52, %v2523_v25 }
 0x3f2   :  { %1028 = vmatpush.msrb.mxu0 %v836_v50  ;;  %1048 = vmatpush.msrb.mxu1 %v837_v59  ;;  %v3031_v50 = vld [vmem:[#allocation3 + $0x30] ss:$0 sm:$0xff] }
 0x3f3   :  { %3587 = vst [vmem:[#allocation14_spill] sm:$0xff] %v3031_v50 }
 0x3f4   :  { %1029 = vmatpush.msrb.mxu0 %v816_v60  ;;  %1049 = vmatpush.msrb.mxu1 %v817_v38  ;;  %v3034_v38 = vld [vmem:[#allocation3 + $0x38] ss:$0 sm:$0xff] }
 0x3f5   :  { %2029 = vmatmul.msk.f32.vlgmr.msrb.gmra.mxu0 %vm414_vm10, %v2493_v19  ;;  %2030 = vmatmul.msk.f32.vlgmr.msrb.gmra.mxu1 %vm414_vm10, %v2493_v19  ;;  %3588 = vst [vmem:[#allocation15_spill] sm:$0xff] %v3034_v38 }
 0x466   :  { %v1071_v55 = vpop.f32.mrf.mxu2 }
 0x467   :  { %v1072_v63 = vadd.f32 %v1071_v55, %v1009_v40 }
 0x469   :  { %v2967_v27 = vmax.f32 %v1072_v63, 0.0 }
 0x46f   :  { %v1091_v6 = vpop.f32.mrf.mxu3 }
 0x470   :  { %v1092_v19 = vadd.f32 %v1091_v6, %v1009_v40 }
 0x472   :  { %v1031_v18 = vpop.f32.mrf.mxu0  ;;  %v1051_v23 = vpop.f32.mrf.mxu1  ;;  %v2959_v62 = vmax.f32 %v1092_v19, 0.0 }
 0x473   :  { %v1032_v31 = vadd.f32 %v1031_v18, %v1009_v40  ;;  %v1052_v53 = vadd.f32 %v1051_v23, %v1009_v40 }
 0x475   :  { %v2943_v49 = vmax.f32 %v1032_v31, 0.0  ;;  %v2945_v47 = vmax.f32 %v1052_v53, 0.0 }
 0x477   :  { %1242 = vrot.lane.b32.xlu1 %v2943_v49, %s2125_s3  ;;  %1160 = vrot.lane.b32.xlu0 %v2945_v47, %s2127_s20 }
 0x478   :  { %1224 = vrot.lane.b32.xlu2 %v2945_v47, %s2124_s2 }
 0x47f   :  { %1222 = vrot.lane.b32.xlu1 %v2943_v49, %s2124_s2  ;;  %1204 = vrot.lane.b32.xlu0 %v2945_v47, %s2123_s0 }
 0x480   :  { %1120 = vrot.lane.b32.xlu2 %v2945_v47, %s2128_s21 }
 0x487   :  { %1202 = vrot.lane.b32.xlu1 %v2943_v49, %s2123_s0  ;;  %1248 = vrot.lane.b32.xlu0 %v2959_v62, %s2125_s3 }
 0x488   :  { %1100 = vrot.lane.b32.xlu2 %v2945_v47, %s2130_s23 }
 0x48f   :  { %1182 = vrot.lane.b32.xlu1 %v2943_v49, %s2126_s19  ;;  %1228 = vrot.lane.b32.xlu0 %v2959_v62, %s2124_s2 }
 0x490   :  { %1246 = vrot.lane.b32.xlu2 %v2967_v27, %s2125_s3 }
 0x497   :  { %1208 = vrot.lane.b32.xlu0 %v2959_v62, %s2123_s0  ;;  %1244 = vrot.lane.b32.xlu1 %v2945_v47, %s2125_s3 }
 0x498   :  { %1226 = vrot.lane.b32.xlu2 %v2967_v27, %s2124_s2 }
 0x49f   :  { %1188 = vrot.lane.b32.xlu0 %v2959_v62, %s2126_s19  ;;  %1140 = vrot.lane.b32.xlu1 %v2945_v47, %s2129_s22 }
 0x4a0   :  { %1206 = vrot.lane.b32.xlu2 %v2967_v27, %s2123_s0 }
 0x4a7   :  { %1144 = vrot.lane.b32.xlu0 %v2959_v62, %s2129_s22  ;;  %1184 = vrot.lane.b32.xlu1 %v2945_v47, %s2126_s19 }
 0x4a8   :  { %1186 = vrot.lane.b32.xlu2 %v2967_v27, %s2126_s19 }
 0x4af   :  { %1122 = vrot.lane.b32.xlu0 %v2967_v27, %s2128_s21  ;;  %1162 = vrot.lane.b32.xlu1 %v2967_v27, %s2127_s20 }
 0x4b0   :  { %1164 = vrot.lane.b32.xlu2 %v2959_v62, %s2127_s20 }
 0x4b7   :  { %1102 = vrot.lane.b32.xlu0 %v2967_v27, %s2130_s23  ;;  %1124 = vrot.lane.b32.xlu1 %v2959_v62, %s2128_s21 }
 0x4b8   :  { %1142 = vrot.lane.b32.xlu2 %v2967_v27, %s2129_s22 }
 0x4bf   :  { %1138 = vrot.lane.b32.xlu0 %v2943_v49, %s2129_s22  ;;  %1104 = vrot.lane.b32.xlu1 %v2959_v62, %s2130_s23 }
 0x4c0   :  { %1158 = vrot.lane.b32.xlu2 %v2943_v49, %s2127_s20 }
 0x4c7   :  { %1302 = vperm.xlu0 %2058, %v3014_v44   ;;  %1118 = vrot.lane.b32.xlu1 %v2943_v49, %s2128_s21 }
 0x4c8   :  { %1098 = vrot.lane.b32.xlu2 %v2943_v49, %s2130_s23 }
 0x4d2   :  { %v1225_v16 = vpop.permute.xlu2 %1224 }
 0x4da   :  { %v3021_v7 = vpop.permute.xlu2 %1120 }
 0x4e2   :  { %v3023_v43 = vpop.permute.xlu2 %1100 }
 0x4e9   :  { %v1243_v41 = vpop.permute.xlu1 %1242  ;;  %v3025_v30 = vpop.permute.xlu0 %1160 }
 0x4ea   :  { %v1247_v51 = vpop.permute.xlu2 %1246 }
 0x4f1   :  { %v1223_v57 = vpop.permute.xlu1 %1222  ;;  %v1205_v4 = vpop.permute.xlu0 %1204 }
 0x4f2   :  { %v1227_v3 = vpop.permute.xlu2 %1226  ;;  %v1232_v55 = vsel %vm329_vm3, %v1223_v57, %v1225_v16 }
 0x4f3   :  { %v1231_v63 = vsel %vm329_vm3, %v1225_v16, %v1227_v3  ;;  %v3057_v16 = vld [vmem:[#allocation3 + $0x20] ss:$0 sm:$0xff] }
 0x4f9   :  { %v1203_v1 = vpop.permute.xlu1 %1202  ;;  %v1249_v13 = vpop.permute.xlu0 %1248 }
 0x4fa   :  { %v1250_v21 = vsel %vm354_vm2, %v1247_v51, %v1249_v13  ;;  %v1253_v52 = vsel %vm354_vm2, %v1249_v13, %v1243_v41  ;;  %v1207_v35 = vpop.permute.xlu2 %1206 }
 0x4fb   :  { %v1256_v59 = vmul.f32 %v3031_v50, %v1250_v21  ;;  %v1257_v60 = vmul.f32 %v3034_v38, %v1253_v52 }
 0x4fd   :  { %1355 = vmatpush.msra.mxu2 %v1256_v59  ;;  %1375 = vmatpush.msra.mxu3 %v1257_v60 }
 0x501   :  { %v1183_v40 = vpop.permute.xlu1 %1182  ;;  %v1229_v18 = vpop.permute.xlu0 %1228 }
 0x502   :  { %v1230_v23 = vsel %vm329_vm3, %v1227_v3, %v1229_v18  ;;  %v1233_v31 = vsel %vm329_vm3, %v1229_v18, %v1223_v57  ;;  %v1187_v53 = vpop.permute.xlu2 %1186 }
 0x503   :  { %v1236_v6 = vmul.f32 %v1230_v23, %v2372_v8  ;;  %v1237_v19 = vmul.f32 %v1233_v31, %v2382_v20 }
 0x505   :  { %1356 = vmatpush.msra.mxu2 %v1236_v6  ;;  %1376 = vmatpush.msra.mxu3 %v1237_v19  ;;  %v3060_v6 = vld [vmem:[#allocation3 + $0x28] ss:$0 sm:$0xff] }
 0x509   :  { %v1209_v13 = vpop.permute.xlu0 %1208  ;;  %v1245_v21 = vpop.permute.xlu1 %1244 }
 0x50a   :  { %v1210_v52 = vsel %vm304_vm4, %v1207_v35, %v1209_v13  ;;  %v1213_v59 = vsel %vm304_vm4, %v1209_v13, %v1203_v1  ;;  %v1165_v60 = vpop.permute.xlu2 %1164  ;;  %v1251_v18 = vsel %vm354_vm2, %v1245_v21, %v1247_v51  ;;  %v1252_v23 = vsel %vm354_vm2, %v1243_v41, %v1245_v21 }
 0x50b   :  { %v1216_v57 = vmul.f32 %v1210_v52, %v2404_v42  ;;  %v1217_v31 = vmul.f32 %v1213_v59, %v2407_v24  ;;  %v1254_v3 = vmul.f32 %v3057_v16, %v1252_v23  ;;  %v1255_v19 = vmul.f32 %v3060_v6, %v1251_v18 }
 0x50c   :  { %v1212_v13 = vsel %vm304_vm4, %v1203_v1, %v1205_v4  ;;  %v1211_v51 = vsel %vm304_vm4, %v1205_v4, %v1207_v35  ;;  %v1234_v41 = vmul.f32 %v1232_v55, %v2297_v34  ;;  %v1235_v21 = vmul.f32 %v1231_v63, %v2337_v56 }
 0x50d   :  { %1315 = vmatpush.msra.mxu0 %v1254_v3  ;;  %1335 = vmatpush.msra.mxu1 %v1255_v19  ;;  %v1214_v52 = vmul.f32 %v1212_v13, %v2308_v39  ;;  %v1215_v59 = vmul.f32 %v1211_v51, %v2346_v61 }
 0x50e   :  { %1357 = vmatpush.msra.mxu2 %v1216_v57  ;;  %1377 = vmatpush.msra.mxu3 %v1217_v31 }
 0x50f   :  { %1316 = vmatpush.msra.mxu0 %v1234_v41  ;;  %1336 = vmatpush.msra.mxu1 %v1235_v21 }
 0x511   :  { %v1189_v18 = vpop.permute.xlu0 %1188  ;;  %1317 = vmatpush.msra.mxu0 %v1214_v52  ;;  %1337 = vmatpush.msra.mxu1 %v1215_v59  ;;  %v1141_v1 = vpop.permute.xlu1 %1140 }
 0x512   :  { %v1190_v4 = vsel %vm279_vm5, %v1187_v53, %v1189_v18  ;;  %v1193_v35 = vsel %vm279_vm5, %v1189_v18, %v1183_v40  ;;  %v1143_v55 = vpop.permute.xlu2 %1142 }
 0x513   :  { %v1196_v63 = vmul.f32 %v1190_v4, %v2420_v54  ;;  %v1197_v23 = vmul.f32 %v1193_v35, %v2423_v58  ;;  %v1147_v4 = vsel %vm225_vm7, %v1141_v1, %v1143_v55 }
 0x515   :  { %1358 = vmatpush.msra.mxu2 %v1196_v63  ;;  %1378 = vmatpush.msra.mxu3 %v1197_v23 }
 0x517   :  { %1359 = vmatpush.msra.mxu2 %v2967_v27  ;;  %1379 = vmatpush.msra.mxu3 %v2959_v62 }
 0x519   :  { %v1145_v57 = vpop.permute.xlu0 %1144  ;;  %v1185_v31 = vpop.permute.xlu1 %1184 }
 0x51a   :  { %v1159_v3 = vpop.permute.xlu2 %1158  ;;  %v1191_v19 = vsel %vm279_vm5, %v1185_v31, %v1187_v53  ;;  %v1192_v13 = vsel %vm279_vm5, %v1183_v40, %v1185_v31  ;;  %v1146_v35 = vsel %vm225_vm7, %v1143_v55, %v1145_v57 }
 0x51b   :  { %v1194_v51 = vmul.f32 %v1192_v13, %v2321_v46  ;;  %v1169_v41 = vsel %vm250_vm6, %v1165_v60, %v1159_v3  ;;  %v1195_v21 = vmul.f32 %v1191_v19, %v2353_v0  ;;  %v1168_v52 = vsel %vm250_vm6, %v1159_v3, %v3025_v30 }
 0x51c   :  { %v1170_v59 = vmul.f32 %v1169_v41, %v2365_v5  ;;  %v1171_v53 = vmul.f32 %v1168_v52, %v2376_v14  ;;  %v1152_v13 = vmul.f32 %v1147_v4, %v2449_v9  ;;  %v1153_v55 = vmul.f32 %v1146_v35, %v2452_v10 }
 0x51d   :  { %1318 = vmatpush.msra.mxu0 %v1194_v51  ;;  %1338 = vmatpush.msra.mxu1 %v1195_v21 }
 0x51f   :  { %1319 = vmatpush.msra.mxu0 %v2943_v49  ;;  %1339 = vmatpush.msra.mxu1 %v2945_v47 }
 0x521   :  { %v1123_v40 = vpop.permute.xlu0 %1122  ;;  %1320 = vmatpush.msra.mxu0 %v1170_v59  ;;  %v1163_v18 = vpop.permute.xlu1 %1162  ;;  %1340 = vmatpush.msra.mxu1 %v1171_v53  ;;  %v3121_v53 = vld [vmem:[%s3561_s6] sm:$0xff]  ;;  %s2131_s6 = smov [#allocation6]  }
 0x522   :  { %v1166_v63 = vsel %vm250_vm6, %v1163_v18, %v1165_v60  ;;  %v1167_v23 = vsel %vm250_vm6, %v3025_v30, %v1163_v18  ;;  %v1127_v19 = vsel %vm200_vm8, %v3021_v7, %v1123_v40  ;;  %s2001_s29 = sshll.u32 %s2131_s6, 4  ;;  %s2002_s29 = int_to_ptr.vmem [resolvable:$true] %s2001_s29 }
 0x523   :  { %v1172_v31 = vmul.f32 %v1167_v23, %v2437_v2  ;;  %v1173_v3 = vmul.f32 %v1166_v63, %v2440_v26  ;;  %v1132_v60 = vmul.f32 %v1127_v19, %v2468_v32  ;;  %v1099_v19 = vpop.permute.xlu2 %1098 }
 0x525   :  { %1360 = vmatpush.msra.mxu2 %v1172_v31  ;;  %1380 = vmatpush.msra.mxu3 %v1173_v3 }
 0x527   :  { %1361 = vmatpush.msra.mxu2 %v1152_v13  ;;  %1381 = vmatpush.msra.mxu3 %v1153_v55 }
 0x529   :  { %v1103_v51 = vpop.permute.xlu0 %1102  ;;  %1362 = vmatpush.msra.mxu2 %v1132_v60  ;;  %v1125_v30 = vpop.permute.xlu1 %1124 }
 0x52a   :  { %v1107_v41 = vsel %vm175_vm9, %v3023_v43, %v1103_v51  ;;  %v1126_v21 = vsel %vm200_vm8, %v1123_v40, %v1125_v30 }
 0x52b   :  { %v1112_v52 = vmul.f32 %v1107_v41, %v2479_v37  ;;  %v1133_v59 = vmul.f32 %v1126_v21, %v2474_v36 }
 0x52d   :  { %1363 = vmatpush.msra.mxu2 %v1112_v52  ;;  %1382 = vmatpush.msra.mxu3 %v1133_v59 }
 0x52e   :  { %2035 = vmatmul.msk.f32.vlgmr.msra.gmra.mxu2 %vm414_vm10, %v3121_v53 }
 0x531   :  { %v1139_v18 = vpop.permute.xlu0 %1138  ;;  %v1105_v4 = vpop.permute.xlu1 %1104 }
 0x532   :  { %v1148_v35 = vsel %vm225_vm7, %v1139_v18, %v1141_v1  ;;  %v1149_v40 = vsel %vm225_vm7, %v1145_v57, %v1139_v18  ;;  %v1106_v63 = vsel %vm175_vm9, %v1103_v51, %v1105_v4  ;;  %v1108_v57 = vsel %vm175_vm9, %v1099_v19, %v3023_v43 }
 0x533   :  { %v1150_v23 = vmul.f32 %v1149_v40, %v2501_v33  ;;  %v1151_v31 = vmul.f32 %v1148_v35, %v2504_v22  ;;  %v1113_v3 = vmul.f32 %v1106_v63, %v2498_v45  ;;  %v1109_v13 = vsel %vm175_vm9, %v1105_v4, %v1099_v19 }
 0x534   :  { %v1111_v21 = vmul.f32 %v1108_v57, %v2529_v48  ;;  %v1110_v52 = vmul.f32 %v1109_v13, %v2526_v28 }
 0x535   :  { %1321 = vmatpush.msra.mxu0 %v1150_v23  ;;  %1341 = vmatpush.msra.mxu1 %v1151_v31 }
 0x536   :  { %1383 = vmatpush.msra.mxu3 %v1113_v3 }
 0x537   :  { %2036 = vmatmul.msk.f32.vlgmr.msra.gmra.mxu3 %vm414_vm10, %v3121_v53 }
 0x539   :  { %v1119_v1 = vpop.permute.xlu1 %1118 }
 0x53a   :  { %v1128_v55 = vsel %vm200_vm8, %v1119_v1, %v3021_v7  ;;  %v1129_v60 = vsel %vm200_vm8, %v1125_v30, %v1119_v1  ;;  %v1303_v7 = vpop.permute.xlu0 %1302 }
 0x53b   :  { %v1130_v51 = vmul.f32 %v1129_v60, %v2520_v12  ;;  %v1131_v41 = vmul.f32 %v1128_v55, %v2523_v25 }
 0x53d   :  { %1322 = vmatpush.msra.mxu0 %v1130_v51  ;;  %1342 = vmatpush.msra.mxu1 %v1131_v41 }
 0x53f   :  { %1323 = vmatpush.msra.mxu0 %v1110_v52  ;;  %1343 = vmatpush.msra.mxu1 %v1111_v21 }
 0x540   :  { %2033 = vmatmul.msk.f32.vlgmr.msra.gmra.mxu0 %vm414_vm10, %v3121_v53  ;;  %2034 = vmatmul.msk.f32.vlgmr.msra.gmra.mxu1 %vm414_vm10, %v3121_v53 }
 0x5b1   :  { %v1365_v19 = vpop.f32.mrf.mxu2 }
 0x5b2   :  { %v1366_v57 = vadd.f32 %v1365_v19, %v1303_v7 }
 0x5b4   :  { %v1390_v13 = vmax.f32 %v1366_v57, 0.0 }
 0x5b6   :  { %v3182_v55 = vadd.f32 %v1390_v13, %v2967_v27 }
 0x5ba   :  { %v1385_v23 = vpop.f32.mrf.mxu3 }
 0x5bb   :  { %v1386_v31 = vadd.f32 %v1385_v23, %v1303_v7 }
 0x5bd   :  { %v1325_v43 = vpop.f32.mrf.mxu0  ;;  %v1345_v30 = vpop.f32.mrf.mxu1  ;;  %v1391_v3 = vmax.f32 %v1386_v31, 0.0 }
 0x5be   :  { %v1326_v59 = vadd.f32 %v1325_v43, %v1303_v7  ;;  %v1346_v18 = vadd.f32 %v1345_v30, %v1303_v7 }
 0x5bf   :  { %v3173_v1 = vadd.f32 %v1391_v3, %v2959_v62 }
 0x5c0   :  { %v1388_v4 = vmax.f32 %v1326_v59, 0.0  ;;  %v1389_v35 = vmax.f32 %v1346_v18, 0.0 }
 0x5c2   :  { %v3155_v40 = vadd.f32 %v1388_v4, %v2943_v49  ;;  %v3158_v63 = vadd.f32 %v1389_v35, %v2945_v47 }
 0x5c4   :  { %1540 = vrot.lane.b32.xlu1 %v3155_v40, %s2125_s3  ;;  %1458 = vrot.lane.b32.xlu0 %v3158_v63, %s2127_s20 }
 0x5c5   :  { %1522 = vrot.lane.b32.xlu2 %v3158_v63, %s2124_s2 }
 0x5cc   :  { %1520 = vrot.lane.b32.xlu1 %v3155_v40, %s2124_s2  ;;  %1502 = vrot.lane.b32.xlu0 %v3158_v63, %s2123_s0 }
 0x5cd   :  { %1418 = vrot.lane.b32.xlu2 %v3158_v63, %s2128_s21 }
 0x5d4   :  { %1500 = vrot.lane.b32.xlu1 %v3155_v40, %s2123_s0  ;;  %1546 = vrot.lane.b32.xlu0 %v3173_v1, %s2125_s3 }
 0x5d5   :  { %1398 = vrot.lane.b32.xlu2 %v3158_v63, %s2130_s23 }
 0x5dc   :  { %1480 = vrot.lane.b32.xlu1 %v3155_v40, %s2126_s19  ;;  %1526 = vrot.lane.b32.xlu0 %v3173_v1, %s2124_s2 }
 0x5dd   :  { %1544 = vrot.lane.b32.xlu2 %v3182_v55, %s2125_s3 }
 0x5e4   :  { %1506 = vrot.lane.b32.xlu0 %v3173_v1, %s2123_s0  ;;  %1542 = vrot.lane.b32.xlu1 %v3158_v63, %s2125_s3 }
 0x5e5   :  { %1524 = vrot.lane.b32.xlu2 %v3182_v55, %s2124_s2 }
 0x5ec   :  { %1486 = vrot.lane.b32.xlu0 %v3173_v1, %s2126_s19  ;;  %1438 = vrot.lane.b32.xlu1 %v3158_v63, %s2129_s22 }
 0x5ed   :  { %1504 = vrot.lane.b32.xlu2 %v3182_v55, %s2123_s0 }
 0x5f4   :  { %1442 = vrot.lane.b32.xlu0 %v3173_v1, %s2129_s22  ;;  %1482 = vrot.lane.b32.xlu1 %v3158_v63, %s2126_s19 }
 0x5f5   :  { %1484 = vrot.lane.b32.xlu2 %v3182_v55, %s2126_s19 }
 0x5fc   :  { %1420 = vrot.lane.b32.xlu0 %v3182_v55, %s2128_s21  ;;  %1460 = vrot.lane.b32.xlu1 %v3182_v55, %s2127_s20 }
 0x5fd   :  { %1462 = vrot.lane.b32.xlu2 %v3173_v1, %s2127_s20 }
 0x604   :  { %1400 = vrot.lane.b32.xlu0 %v3182_v55, %s2130_s23  ;;  %1422 = vrot.lane.b32.xlu1 %v3173_v1, %s2128_s21 }
 0x605   :  { %1440 = vrot.lane.b32.xlu2 %v3182_v55, %s2129_s22 }
 0x60c   :  { %1436 = vrot.lane.b32.xlu0 %v3155_v40, %s2129_s22  ;;  %1402 = vrot.lane.b32.xlu1 %v3173_v1, %s2130_s23 }
 0x60d   :  { %1456 = vrot.lane.b32.xlu2 %v3155_v40, %s2127_s20 }
 0x614   :  { %1600 = vperm.xlu0 %2058, %v3014_v44   ;;  %1416 = vrot.lane.b32.xlu1 %v3155_v40, %s2128_s21 }
 0x615   :  { %1396 = vrot.lane.b32.xlu2 %v3155_v40, %s2130_s23 }
 0x61f   :  { %v1523_v60 = vpop.permute.xlu2 %1522 }
 0x627   :  { %v3231_v51 = vpop.permute.xlu2 %1418 }
 0x62f   :  { %v3233_v41 = vpop.permute.xlu2 %1398 }
 0x636   :  { %v1541_v21 = vpop.permute.xlu1 %1540  ;;  %v3235_v52 = vpop.permute.xlu0 %1458 }
 0x637   :  { %v1545_v7 = vpop.permute.xlu2 %1544 }
 0x63e   :  { %v1521_v43 = vpop.permute.xlu1 %1520  ;;  %v1503_v30 = vpop.permute.xlu0 %1502 }
 0x63f   :  { %v1525_v59 = vpop.permute.xlu2 %1524 }
 0x646   :  { %v1501_v18 = vpop.permute.xlu1 %1500  ;;  %v1547_v4 = vpop.permute.xlu0 %1546 }
 0x647   :  { %v1548_v35 = vsel %vm354_vm2, %v1545_v7, %v1547_v4  ;;  %v1551_v23 = vsel %vm354_vm2, %v1547_v4, %v1541_v21  ;;  %v1505_v31 = vpop.permute.xlu2 %1504 }
 0x648   :  { %v1554_v3 = vmul.f32 %v3031_v50, %v1548_v35  ;;  %v1555_v19 = vmul.f32 %v3034_v38, %v1551_v23  ;;  %v1530_v35 = vsel %vm329_vm3, %v1521_v43, %v1523_v60  ;;  %v1529_v23 = vsel %vm329_vm3, %v1523_v60, %v1525_v59 }
 0x64a   :  { %1653 = vmatpush.msrb.mxu2 %v1554_v3  ;;  %1673 = vmatpush.msrb.mxu3 %v1555_v19 }
 0x64e   :  { %v1481_v57 = vpop.permute.xlu1 %1480  ;;  %v1527_v13 = vpop.permute.xlu0 %1526 }
 0x64f   :  { %v1528_v11 = vsel %vm329_vm3, %v1525_v59, %v1527_v13  ;;  %v1531_v15 = vsel %vm329_vm3, %v1527_v13, %v1521_v43  ;;  %v1485_v17 = vpop.permute.xlu2 %1484 }
 0x650   :  { %v1534_v44 = vmul.f32 %v1528_v11, %v2372_v8  ;;  %v1535_v4 = vmul.f32 %v1531_v15, %v2382_v20  ;;  %v1532_v20 = vmul.f32 %v1530_v35, %v2297_v34 }
 0x652   :  { %1654 = vmatpush.msrb.mxu2 %v1534_v44  ;;  %1674 = vmatpush.msrb.mxu3 %v1535_v4  ;;  %v1510_v4 = vsel %vm304_vm4, %v1501_v18, %v1503_v30 }
 0x656   :  { %v1507_v3 = vpop.permute.xlu0 %1506  ;;  %v1543_v19 = vpop.permute.xlu1 %1542 }
 0x657   :  { %v1508_v38 = vsel %vm304_vm4, %v1505_v31, %v1507_v3  ;;  %v1511_v13 = vsel %vm304_vm4, %v1507_v3, %v1501_v18  ;;  %v1463_v50 = vpop.permute.xlu2 %1462  ;;  %v1549_v11 = vsel %vm354_vm2, %v1543_v19, %v1545_v7  ;;  %v1550_v15 = vsel %vm354_vm2, %v1541_v21, %v1543_v19 }
 0x658   :  { %v1514_v44 = vmul.f32 %v1508_v38, %v2404_v42  ;;  %v1515_v43 = vmul.f32 %v1511_v13, %v2407_v24  ;;  %v1552_v60 = vmul.f32 %v3057_v16, %v1550_v15  ;;  %v1553_v59 = vmul.f32 %v3060_v6, %v1549_v11 }
 0x659   :  { %v1509_v3 = vsel %vm304_vm4, %v1503_v30, %v1505_v31  ;;  %v1533_v7 = vmul.f32 %v1529_v23, %v2337_v56  ;;  %v1512_v38 = vmul.f32 %v1510_v4, %v2308_v39 }
 0x65a   :  { %1613 = vmatpush.msrb.mxu0 %v1552_v60  ;;  %1633 = vmatpush.msrb.mxu1 %v1553_v59  ;;  %v1513_v21 = vmul.f32 %v1509_v3, %v2346_v61 }
 0x65b   :  { %1655 = vmatpush.msrb.mxu2 %v1514_v44  ;;  %1675 = vmatpush.msrb.mxu3 %v1515_v43 }
 0x65c   :  { %1614 = vmatpush.msrb.mxu0 %v1532_v20  ;;  %1634 = vmatpush.msrb.mxu1 %v1533_v7 }
 0x65e   :  { %v1487_v19 = vpop.permute.xlu0 %1486  ;;  %1615 = vmatpush.msrb.mxu0 %v1512_v38  ;;  %1635 = vmatpush.msrb.mxu1 %v1513_v21  ;;  %v1439_v18 = vpop.permute.xlu1 %1438 }
 0x65f   :  { %v1488_v30 = vsel %vm279_vm5, %v1485_v17, %v1487_v19  ;;  %v1491_v31 = vsel %vm279_vm5, %v1487_v19, %v1481_v57  ;;  %v1441_v35 = vpop.permute.xlu2 %1440 }
 0x660   :  { %v1494_v23 = vmul.f32 %v1488_v30, %v2420_v54  ;;  %v1495_v13 = vmul.f32 %v1491_v31, %v2423_v58  ;;  %v1445_v7 = vsel %vm225_vm7, %v1439_v18, %v1441_v35 }
 0x661   :  { %v1450_v31 = vmul.f32 %v1445_v7, %v2449_v9 }
 0x662   :  { %1656 = vmatpush.msrb.mxu2 %v1494_v23  ;;  %1676 = vmatpush.msrb.mxu3 %v1495_v13 }
 0x664   :  { %1657 = vmatpush.msrb.mxu2 %v3182_v55  ;;  %1677 = vmatpush.msrb.mxu3 %v3173_v1 }
 0x666   :  { %v1443_v20 = vpop.permute.xlu0 %1442  ;;  %v1483_v11 = vpop.permute.xlu1 %1482 }
 0x667   :  { %v1457_v15 = vpop.permute.xlu2 %1456  ;;  %v1489_v44 = vsel %vm279_vm5, %v1483_v11, %v1485_v17  ;;  %v1490_v43 = vsel %vm279_vm5, %v1481_v57, %v1483_v11  ;;  %v1444_v38 = vsel %vm225_vm7, %v1441_v35, %v1443_v20 }
 0x668   :  { %v1492_v60 = vmul.f32 %v1490_v43, %v2321_v46  ;;  %v1467_v59 = vsel %vm250_vm6, %v1463_v50, %v1457_v15  ;;  %v1493_v4 = vmul.f32 %v1489_v44, %v2353_v0  ;;  %v1466_v1 = vsel %vm250_vm6, %v1457_v15, %v3235_v52 }
 0x669   :  { %v1468_v55 = vmul.f32 %v1467_v59, %v2365_v5  ;;  %v1469_v17 = vmul.f32 %v1466_v1, %v2376_v14  ;;  %v1451_v35 = vmul.f32 %v1444_v38, %v2452_v10 }
 0x66a   :  { %1616 = vmatpush.msrb.mxu0 %v1492_v60  ;;  %1636 = vmatpush.msrb.mxu1 %v1493_v4 }
 0x66c   :  { %1617 = vmatpush.msrb.mxu0 %v3155_v40  ;;  %1637 = vmatpush.msrb.mxu1 %v3158_v63 }
 0x66e   :  { %v1421_v57 = vpop.permute.xlu0 %1420  ;;  %1618 = vmatpush.msrb.mxu0 %v1468_v55  ;;  %v1461_v3 = vpop.permute.xlu1 %1460  ;;  %1638 = vmatpush.msrb.mxu1 %v1469_v17 }
 0x66f   :  { %v1464_v21 = vsel %vm250_vm6, %v1461_v3, %v1463_v50  ;;  %v1465_v40 = vsel %vm250_vm6, %v3235_v52, %v1461_v3  ;;  %v1425_v30 = vsel %vm200_vm8, %v3231_v51, %v1421_v57  ;;  %v1397_v3 = vpop.permute.xlu2 %1396 }
 0x670   :  { %v1470_v19 = vmul.f32 %v1465_v40, %v2437_v2  ;;  %v1471_v63 = vmul.f32 %v1464_v21, %v2440_v26  ;;  %v1430_v50 = vmul.f32 %v1425_v30, %v2468_v32 }
 0x672   :  { %1658 = vmatpush.msrb.mxu2 %v1470_v19  ;;  %1678 = vmatpush.msrb.mxu3 %v1471_v63 }
 0x674   :  { %1659 = vmatpush.msrb.mxu2 %v1450_v31  ;;  %1679 = vmatpush.msrb.mxu3 %v1451_v35 }
 0x676   :  { %v1401_v23 = vpop.permute.xlu0 %1400  ;;  %1660 = vmatpush.msrb.mxu2 %v1430_v50  ;;  %v1423_v52 = vpop.permute.xlu1 %1422 }
 0x677   :  { %v1405_v13 = vsel %vm175_vm9, %v3233_v41, %v1401_v23  ;;  %v1424_v11 = vsel %vm200_vm8, %v1421_v57, %v1423_v52 }
 0x678   :  { %v1410_v15 = vmul.f32 %v1405_v13, %v2479_v37  ;;  %v1431_v44 = vmul.f32 %v1424_v11, %v2474_v36 }
 0x67a   :  { %1661 = vmatpush.msrb.mxu2 %v1410_v15  ;;  %1680 = vmatpush.msrb.mxu3 %v1431_v44 }
 0x67b   :  { %2039 = vmatmul.msk.f32.vlgmr.msrb.gmra.mxu2 %vm414_vm10, %v3121_v53 }
 0x67e   :  { %v1437_v43 = vpop.permute.xlu0 %1436  ;;  %v1403_v60 = vpop.permute.xlu1 %1402 }
 0x67f   :  { %v1446_v59 = vsel %vm225_vm7, %v1437_v43, %v1439_v18  ;;  %v1447_v4 = vsel %vm225_vm7, %v1443_v20, %v1437_v43  ;;  %v1404_v1 = vsel %vm175_vm9, %v1401_v23, %v1403_v60  ;;  %v1406_v20 = vsel %vm175_vm9, %v1397_v3, %v3233_v41 }
 0x680   :  { %v1448_v55 = vmul.f32 %v1447_v4, %v2501_v33  ;;  %v1449_v17 = vmul.f32 %v1446_v59, %v2504_v22  ;;  %v1411_v57 = vmul.f32 %v1404_v1, %v2498_v45  ;;  %v1407_v7 = vsel %vm175_vm9, %v1403_v60, %v1397_v3 }
 0x681   :  { %v1409_v63 = vmul.f32 %v1406_v20, %v2529_v48  ;;  %v1408_v30 = vmul.f32 %v1407_v7, %v2526_v28 }
 0x682   :  { %1619 = vmatpush.msrb.mxu0 %v1448_v55  ;;  %1639 = vmatpush.msrb.mxu1 %v1449_v17 }
 0x683   :  { %1681 = vmatpush.msrb.mxu3 %v1411_v57 }
 0x684   :  { %2040 = vmatmul.msk.f32.vlgmr.msrb.gmra.mxu3 %vm414_vm10, %v3121_v53 }
 0x686   :  { %v1417_v18 = vpop.permute.xlu1 %1416 }
 0x687   :  { %v1426_v38 = vsel %vm200_vm8, %v1417_v18, %v3231_v51  ;;  %v1427_v21 = vsel %vm200_vm8, %v1423_v52, %v1417_v18  ;;  %v1601_v51 = vpop.permute.xlu0 %1600 }
 0x688   :  { %v1428_v40 = vmul.f32 %v1427_v21, %v2520_v12  ;;  %v1429_v19 = vmul.f32 %v1426_v38, %v2523_v25 }
 0x68a   :  { %1620 = vmatpush.msrb.mxu0 %v1428_v40  ;;  %1640 = vmatpush.msrb.mxu1 %v1429_v19 }
 0x68c   :  { %1621 = vmatpush.msrb.mxu0 %v1408_v30  ;;  %1641 = vmatpush.msrb.mxu1 %v1409_v63  ;;  %v3590_v30 = vld [vmem:[#allocation14_spill] sm:$0xff] }
 0x68d   :  { %2037 = vmatmul.msk.f32.vlgmr.msrb.gmra.mxu0 %vm414_vm10, %v3121_v53  ;;  %2038 = vmatmul.msk.f32.vlgmr.msrb.gmra.mxu1 %vm414_vm10, %v3121_v53 }
 0x707   :  { %v1683_v15 = vpop.f32.mrf.mxu3 }
 0x708   :  { %v1684_v44 = vadd.f32 %v1683_v15, %v1601_v51 }
 0x70a   :  { %v1623_v41 = vpop.f32.mrf.mxu0  ;;  %v1643_v31 = vpop.f32.mrf.mxu1 }
 0x70b   :  { %v1624_v35 = vadd.f32 %v1623_v41, %v1601_v51  ;;  %v1644_v50 = vadd.f32 %v1643_v31, %v1601_v51  ;;  %v3591_v41 = vld [vmem:[#allocation15_spill] sm:$0xff] }
 0x70d   :  { %v1686_v23 = vmax.f32 %v1624_v35, 0.0  ;;  %v1687_v52 = vmax.f32 %v1644_v50, 0.0 }
 0x70f   :  { %v3352_v13 = vadd.f32 %v1686_v23, %v2943_v49  ;;  %v3355_v11 = vadd.f32 %v1687_v52, %v2945_v47  ;;  %v1689_v49 = vmax.f32 %v1684_v44, 0.0  ;;  %v1663_v47 = vpop.f32.mrf.mxu2 }
 0x710   :  { %v1664_v60 = vadd.f32 %v1663_v47, %v1601_v51 }
 0x711   :  { %1838 = vrot.lane.b32.xlu1 %v3352_v13, %s2125_s3  ;;  %1756 = vrot.lane.b32.xlu0 %v3355_v11, %s2127_s20  ;;  %v3370_v43 = vadd.f32 %v1689_v49, %v2959_v62  ;;  %v3589_v62 = vld [vmem:[#allocation13_spill] sm:$0xff]  ;;  %v3592_v49 = vld [vmem:[#allocation16_spill] sm:$0xff] }
 0x712   :  { %1820 = vrot.lane.b32.xlu2 %v3355_v11, %s2124_s2  ;;  %v1688_v59 = vmax.f32 %v1664_v60, 0.0 }
 0x714   :  { %v3379_v4 = vadd.f32 %v1688_v59, %v2967_v27 }
 0x719   :  { %1818 = vrot.lane.b32.xlu1 %v3352_v13, %s2124_s2  ;;  %1800 = vrot.lane.b32.xlu0 %v3355_v11, %s2123_s0 }
 0x71a   :  { %1716 = vrot.lane.b32.xlu2 %v3355_v11, %s2128_s21 }
 0x721   :  { %1798 = vrot.lane.b32.xlu1 %v3352_v13, %s2123_s0  ;;  %1844 = vrot.lane.b32.xlu0 %v3370_v43, %s2125_s3 }
 0x722   :  { %1696 = vrot.lane.b32.xlu2 %v3355_v11, %s2130_s23 }
 0x729   :  { %1778 = vrot.lane.b32.xlu1 %v3352_v13, %s2126_s19  ;;  %1824 = vrot.lane.b32.xlu0 %v3370_v43, %s2124_s2 }
 0x72a   :  { %1842 = vrot.lane.b32.xlu2 %v3379_v4, %s2125_s3 }
 0x731   :  { %1804 = vrot.lane.b32.xlu0 %v3370_v43, %s2123_s0  ;;  %1840 = vrot.lane.b32.xlu1 %v3355_v11, %s2125_s3 }
 0x732   :  { %1822 = vrot.lane.b32.xlu2 %v3379_v4, %s2124_s2 }
 0x739   :  { %1784 = vrot.lane.b32.xlu0 %v3370_v43, %s2126_s19  ;;  %1736 = vrot.lane.b32.xlu1 %v3355_v11, %s2129_s22 }
 0x73a   :  { %1802 = vrot.lane.b32.xlu2 %v3379_v4, %s2123_s0 }
 0x741   :  { %1740 = vrot.lane.b32.xlu0 %v3370_v43, %s2129_s22  ;;  %1780 = vrot.lane.b32.xlu1 %v3355_v11, %s2126_s19 }
 0x742   :  { %1782 = vrot.lane.b32.xlu2 %v3379_v4, %s2126_s19 }
 0x749   :  { %1718 = vrot.lane.b32.xlu0 %v3379_v4, %s2128_s21  ;;  %1758 = vrot.lane.b32.xlu1 %v3379_v4, %s2127_s20 }
 0x74a   :  { %1760 = vrot.lane.b32.xlu2 %v3370_v43, %s2127_s20 }
 0x751   :  { %1698 = vrot.lane.b32.xlu0 %v3379_v4, %s2130_s23  ;;  %1720 = vrot.lane.b32.xlu1 %v3370_v43, %s2128_s21 }
 0x752   :  { %1738 = vrot.lane.b32.xlu2 %v3379_v4, %s2129_s22 }
 0x759   :  { %1734 = vrot.lane.b32.xlu0 %v3352_v13, %s2129_s22  ;;  %1700 = vrot.lane.b32.xlu1 %v3370_v43, %s2130_s23 }
 0x75a   :  { %1754 = vrot.lane.b32.xlu2 %v3352_v13, %s2127_s20 }
 0x761   :  { %1898 = vperm.xlu0 %2058, %v3589_v62   ;;  %1714 = vrot.lane.b32.xlu1 %v3352_v13, %s2128_s21 }
 0x762   :  { %1694 = vrot.lane.b32.xlu2 %v3352_v13, %s2130_s23 }
 0x76c   :  { %v1821_v27 = vpop.permute.xlu2 %1820 }
 0x774   :  { %v3428_v1 = vpop.permute.xlu2 %1716 }
 0x77c   :  { %v3430_v55 = vpop.permute.xlu2 %1696 }
 0x783   :  { %v1839_v17 = vpop.permute.xlu1 %1838  ;;  %v3432_v57 = vpop.permute.xlu0 %1756 }
 0x784   :  { %v1843_v3 = vpop.permute.xlu2 %1842 }
 0x78b   :  { %v1819_v18 = vpop.permute.xlu1 %1818  ;;  %v1801_v20 = vpop.permute.xlu0 %1800 }
 0x78c   :  { %v1823_v7 = vpop.permute.xlu2 %1822  ;;  %v1828_v60 = vsel %vm329_vm3, %v1819_v18, %v1821_v27 }
 0x78d   :  { %v1827_v59 = vsel %vm329_vm3, %v1821_v27, %v1823_v7 }
 0x793   :  { %v1799_v38 = vpop.permute.xlu1 %1798  ;;  %v1845_v21 = vpop.permute.xlu0 %1844 }
 0x794   :  { %v1846_v40 = vsel %vm354_vm2, %v1843_v3, %v1845_v21  ;;  %v1849_v19 = vsel %vm354_vm2, %v1845_v21, %v1839_v17  ;;  %v1803_v63 = vpop.permute.xlu2 %1802 }
 0x795   :  { %v1852_v51 = vmul.f32 %v3590_v30, %v1846_v40  ;;  %v1853_v31 = vmul.f32 %v3591_v41, %v1849_v19 }
 0x797   :  { %1951 = vmatpush.msra.mxu2 %v1852_v51  ;;  %1971 = vmatpush.msra.mxu3 %v1853_v31  ;;  %v1808_v31 = vsel %vm304_vm4, %v1799_v38, %v1801_v20 }
 0x79b   :  { %v1779_v35 = vpop.permute.xlu1 %1778  ;;  %v1825_v50 = vpop.permute.xlu0 %1824 }
 0x79c   :  { %v1826_v23 = vsel %vm329_vm3, %v1823_v7, %v1825_v50  ;;  %v1829_v52 = vsel %vm329_vm3, %v1825_v50, %v1819_v18  ;;  %v1783_v15 = vpop.permute.xlu2 %1782  ;;  %v1807_v50 = vsel %vm304_vm4, %v1801_v20, %v1803_v63 }
 0x79d   :  { %v1832_v44 = vmul.f32 %v1826_v23, %v2372_v8  ;;  %v1833_v47 = vmul.f32 %v1829_v52, %v3592_v49  ;;  %v1830_v23 = vmul.f32 %v1828_v60, %v2297_v34 }
 0x79f   :  { %1952 = vmatpush.msra.mxu2 %v1832_v44  ;;  %1972 = vmatpush.msra.mxu3 %v1833_v47 }
 0x7a3   :  { %v1805_v62 = vpop.permute.xlu0 %1804  ;;  %v1841_v21 = vpop.permute.xlu1 %1840 }
 0x7a4   :  { %v1806_v40 = vsel %vm304_vm4, %v1803_v63, %v1805_v62  ;;  %v1809_v19 = vsel %vm304_vm4, %v1805_v62, %v1799_v38  ;;  %v1761_v30 = vpop.permute.xlu2 %1760  ;;  %v1847_v8 = vsel %vm354_vm2, %v1841_v21, %v1843_v3  ;;  %v1848_v51 = vsel %vm354_vm2, %v1839_v17, %v1841_v21 }
 0x7a5   :  { %v1812_v18 = vmul.f32 %v1806_v40, %v2404_v42  ;;  %v1813_v41 = vmul.f32 %v1809_v19, %v2407_v24  ;;  %v1850_v27 = vmul.f32 %v3057_v16, %v1848_v51  ;;  %v1851_v7 = vmul.f32 %v3060_v6, %v1847_v8 }
 0x7a6   :  { %v1831_v3 = vmul.f32 %v1827_v59, %v2337_v56  ;;  %v1810_v42 = vmul.f32 %v1808_v31, %v2308_v39  ;;  %v1811_v24 = vmul.f32 %v1807_v50, %v2346_v61 }
 0x7a7   :  { %1911 = vmatpush.msra.mxu0 %v1850_v27  ;;  %1931 = vmatpush.msra.mxu1 %v1851_v7 }
 0x7a8   :  { %1953 = vmatpush.msra.mxu2 %v1812_v18  ;;  %1973 = vmatpush.msra.mxu3 %v1813_v41 }
 0x7a9   :  { %1912 = vmatpush.msra.mxu0 %v1830_v23  ;;  %1932 = vmatpush.msra.mxu1 %v1831_v3 }
 0x7ab   :  { %v1785_v16 = vpop.permute.xlu0 %1784  ;;  %1913 = vmatpush.msra.mxu0 %v1810_v42  ;;  %1933 = vmatpush.msra.mxu1 %v1811_v24  ;;  %v1737_v6 = vpop.permute.xlu1 %1736  ;;  %v3593_v42 = vld [vmem:[#allocation12_spill] sm:$0xff] }
 0x7ac   :  { %v1786_v17 = vsel %vm279_vm5, %v1783_v15, %v1785_v16  ;;  %v1789_v34 = vsel %vm279_vm5, %v1785_v16, %v1779_v35  ;;  %v1739_v56 = vpop.permute.xlu2 %1738 }
 0x7ad   :  { %v1792_v20 = vmul.f32 %v1786_v17, %v2420_v54  ;;  %v1793_v38 = vmul.f32 %v1789_v34, %v2423_v58 }
 0x7af   :  { %1954 = vmatpush.msra.mxu2 %v1792_v20  ;;  %1974 = vmatpush.msra.mxu3 %v1793_v38 }
 0x7b1   :  { %1955 = vmatpush.msra.mxu2 %v3379_v4  ;;  %1975 = vmatpush.msra.mxu3 %v3370_v43 }
 0x7b3   :  { %v1741_v39 = vpop.permute.xlu0 %1740  ;;  %v1781_v61 = vpop.permute.xlu1 %1780 }
 0x7b4   :  { %v1755_v63 = vpop.permute.xlu2 %1754  ;;  %v1787_v52 = vsel %vm279_vm5, %v1781_v61, %v1783_v15  ;;  %v1788_v44 = vsel %vm279_vm5, %v1779_v35, %v1781_v61  ;;  %v1742_v47 = vsel %vm225_vm7, %v1739_v56, %v1741_v39 }
 0x7b5   :  { %v1790_v49 = vmul.f32 %v1788_v44, %v2321_v46  ;;  %v1765_v54 = vsel %vm250_vm6, %v1761_v30, %v1755_v63  ;;  %v1791_v58 = vmul.f32 %v1787_v52, %v2353_v0  ;;  %v1764_v43 = vsel %vm250_vm6, %v1755_v63, %v3432_v57  ;;  %v3596_v63 = vld [vmem:[#allocation10_spill] sm:$0xff] }
 0x7b6   :  { %v1766_v4 = vmul.f32 %v1765_v54, %v2365_v5  ;;  %v1767_v15 = vmul.f32 %v1764_v43, %v2376_v14  ;;  %v1743_v0 = vsel %vm225_vm7, %v1737_v6, %v1739_v56  ;;  %v1749_v62 = vmul.f32 %v1742_v47, %v2452_v10  ;;  %v3594_v56 = vld [vmem:[#allocation11_spill] sm:$0xff] }
 0x7b7   :  { %1914 = vmatpush.msra.mxu0 %v1790_v49  ;;  %1934 = vmatpush.msra.mxu1 %v1791_v58  ;;  %v1748_v59 = vmul.f32 %v1743_v0, %v2449_v9 }
 0x7b9   :  { %1915 = vmatpush.msra.mxu0 %v3352_v13  ;;  %1935 = vmatpush.msra.mxu1 %v3355_v11 }
 0x7bb   :  { %v1719_v46 = vpop.permute.xlu0 %1718  ;;  %1916 = vmatpush.msra.mxu0 %v1766_v4  ;;  %v1759_v35 = vpop.permute.xlu1 %1758  ;;  %1936 = vmatpush.msra.mxu1 %v1767_v15 }
 0x7bc   :  { %v1762_v60 = vsel %vm250_vm6, %v1759_v35, %v1761_v30  ;;  %v1763_v5 = vsel %vm250_vm6, %v3432_v57, %v1759_v35  ;;  %v1723_v11 = vsel %vm200_vm8, %v3428_v1, %v1719_v46  ;;  %v1695_v41 = vpop.permute.xlu2 %1694 }
 0x7bd   :  { %v1768_v14 = vmul.f32 %v1763_v5, %v2437_v2  ;;  %v1769_v13 = vmul.f32 %v1762_v60, %v2440_v26  ;;  %v1728_v21 = vmul.f32 %v1723_v11, %v2468_v32  ;;  %v1704_v7 = vsel %vm175_vm9, %v1695_v41, %v3430_v55 }
 0x7be   :  { %v1707_v23 = vmul.f32 %v1704_v7, %v2529_v48 }
 0x7bf   :  { %1956 = vmatpush.msra.mxu2 %v1768_v14  ;;  %1976 = vmatpush.msra.mxu3 %v1769_v13 }
 0x7c1   :  { %1957 = vmatpush.msra.mxu2 %v1748_v59  ;;  %1977 = vmatpush.msra.mxu3 %v1749_v62 }
 0x7c3   :  { %v1699_v40 = vpop.permute.xlu0 %1698  ;;  %1958 = vmatpush.msra.mxu2 %v1728_v21  ;;  %v1721_v57 = vpop.permute.xlu1 %1720 }
 0x7c4   :  { %v1703_v2 = vsel %vm175_vm9, %v3430_v55, %v1699_v40  ;;  %v1722_v26 = vsel %vm200_vm8, %v1719_v46, %v1721_v57 }
 0x7c5   :  { %v1708_v9 = vmul.f32 %v1703_v2, %v2479_v37  ;;  %v1729_v10 = vmul.f32 %v1722_v26, %v2474_v36 }
 0x7c7   :  { %1959 = vmatpush.msra.mxu2 %v1708_v9  ;;  %1978 = vmatpush.msra.mxu3 %v1729_v10 }
 0x7c8   :  { %2043 = vmatmul.msk.f32.vlgmr.msra.gmra.mxu2 %vm414_vm10, %v3121_v53 }
 0x7cb   :  { %v1735_v32 = vpop.permute.xlu0 %1734  ;;  %v1701_v19 = vpop.permute.xlu1 %1700 }
 0x7cc   :  { %v1744_v30 = vsel %vm225_vm7, %v1735_v32, %v1737_v6  ;;  %v1745_v8 = vsel %vm225_vm7, %v1741_v39, %v1735_v32  ;;  %v1702_v51 = vsel %vm175_vm9, %v1699_v40, %v1701_v19  ;;  %v1705_v31 = vsel %vm175_vm9, %v1701_v19, %v1695_v41 }
 0x7cd   :  { %v1746_v37 = vmul.f32 %v1745_v8, %v2501_v33  ;;  %v1747_v36 = vmul.f32 %v1744_v30, %v2504_v22  ;;  %v1709_v18 = vmul.f32 %v1702_v51, %v2498_v45  ;;  %v1706_v3 = vmul.f32 %v1705_v31, %v2526_v28 }
 0x7cf   :  { %1917 = vmatpush.msra.mxu0 %v1746_v37  ;;  %1937 = vmatpush.msra.mxu1 %v1747_v36 }
 0x7d0   :  { %1979 = vmatpush.msra.mxu3 %v1709_v18 }
 0x7d1   :  { %2044 = vmatmul.msk.f32.vlgmr.msra.gmra.mxu3 %vm414_vm10, %v3121_v53 }
 0x7d3   :  { %v1715_v27 = vpop.permute.xlu1 %1714  ;;  %v1899_v29 = vpop.permute.xlu0 %1898 }
 0x7d4   :  { %v1724_v33 = vsel %vm200_vm8, %v1715_v27, %v3428_v1  ;;  %v1725_v45 = vsel %vm200_vm8, %v1721_v57, %v1715_v27 }
 0x7d5   :  { %v1726_v22 = vmul.f32 %v1725_v45, %v2520_v12  ;;  %v1727_v50 = vmul.f32 %v1724_v33, %v2523_v25 }
 0x7d7   :  { %1918 = vmatpush.msra.mxu0 %v1726_v22  ;;  %1938 = vmatpush.msra.mxu1 %v1727_v50 }
 0x7d9   :  { %1919 = vmatpush.msra.mxu0 %v1706_v3  ;;  %1939 = vmatpush.msra.mxu1 %v1707_v23 }
 0x7da   :  { %2041 = vmatmul.msk.f32.vlgmr.msra.gmra.mxu0 %vm414_vm10, %v3121_v53  ;;  %2042 = vmatmul.msk.f32.vlgmr.msra.gmra.mxu1 %vm414_vm10, %v3121_v53  ;;  %v3595_v53 = vld [vmem:[#allocation9_spill] sm:$0xff] }
 0x84b   :  { %v1961_v1 = vpop.f32.mrf.mxu2 }
 0x84c   :  { %v1962_v55 = vadd.f32 %v1961_v1, %v1899_v29 }
 0x84e   :  { %v1986_v12 = vmax.f32 %v1962_v55, 0.0 }
 0x850   :  { %v1990_v25 = vadd.f32 %v1986_v12, %v3593_v42 }
 0x852   :  { %1994 = vst [vmem:[#allocation6 + $0x10] sm:$0xff] %v1990_v25 }
 0x854   :  { %v1981_v48 = vpop.f32.mrf.mxu3 }
 0x855   :  { %v1982_v24 = vadd.f32 %v1981_v48, %v1899_v29 }
 0x857   :  { %v1987_v28 = vmax.f32 %v1982_v24, 0.0  ;;  %v1921_v16 = vpop.f32.mrf.mxu0  ;;  %v1941_v6 = vpop.f32.mrf.mxu1 }
 0x858   :  { %v1922_v17 = vadd.f32 %v1921_v16, %v1899_v29  ;;  %v1942_v34 = vadd.f32 %v1941_v6, %v1899_v29 }
 0x859   :  { %v1991_v20 = vadd.f32 %v1987_v28, %v3594_v56 }
 0x85a   :  { %v1984_v38 = vmax.f32 %v1922_v17, 0.0  ;;  %v1985_v39 = vmax.f32 %v1942_v34, 0.0 }
 0x85b   :  { %1995 = vst [vmem:[#allocation6 + $0x18] sm:$0xff] %v1991_v20 }
 0x85c   :  { %v1988_v61 = vadd.f32 %v1984_v38, %v3595_v53  ;;  %v1989_v52 = vadd.f32 %v1985_v39, %v3596_v63 }
 0x85e   :  { %1992 = vst [vmem:[#allocation6] sm:$0xff] %v1988_v61 }
 0x85f   :  { %1993 = vst [vmem:[#allocation6 + $0x8] sm:$0xff] %v1989_v52 }
 0x860   :  { %2006 = dma.vmem_to_hbm [thread:$0]  %s2002_s29, 512, %s2004_s10, [#allocation5]  }
 0x861   :  { %2117 = dma.done.wait [#allocation5], 512  }
 0x862   :  { %2118 = vsyncadd [#allocation5], 4294966784 }
 0x863   :  { %2011 = vsyncpa [#allocation4], 1 }
 0x864   :  { %2012 = vsyncpa [#allocation5], 1 }

</bundles_post_ra>
